<compile_context>
chip_gen: v5e
topology: v5e:2x2
jax: 0.10.0
libtpu: 0.0.40
codegen_flags: <defaults>
</compile_context>

<pallas_src>
import jax
import jax.numpy as jnp
from jax import lax
from jax.experimental import pallas as pl
from jax.experimental.pallas import tpu as pltpu


def rnn_forward_kernel(x_ref, wv_ref,
                       wih_ref, whh_ref, brnn_ref,
                       wwv_ref, bwv_ref,
                       bns_h_ref, bnt_h_ref,
                       bns_p1_ref, bnt_p1_ref,
                       bns_p2_ref, bnt_p2_ref,
                       wfc_h_ref, wfc_p1_ref, wfc_p2_ref, bfc_ref,
                       out_ref, fcbn_ref):
    """One batch block of the whole forward pass (everything fits VMEM)."""
    Bb = out_ref.shape[0]
    T = x_ref.shape[0] // Bb
    H = whh_ref.shape[0]
    P = wwv_ref.shape[1]
    Lp = fcbn_ref.shape[1]
    L = H + 2 * P

    # --- wavelet branch: one stacked bf16 matmul (f32 acc), issued before the
    #     serial recurrence so its MXU/VPU work overlaps the loop.
    wv_out = (jnp.dot(wv_ref[...], wwv_ref[...], preferred_element_type=jnp.float32)
              + bwv_ref[...])                                    # (2*Bb, P) f32

    # --- hoisted input-side projection for ALL timesteps (operands already bf16
    #     from the wrapper -> no in-kernel convert on the step-0 dependent path).
    xz = (jnp.dot(x_ref[...], wih_ref[...], preferred_element_type=jnp.float32)
          + brnn_ref[...])                                       # (T*Bb, 4H) f32

    whh = whh_ref[...]                                           # (H, 4H) bf16

    h = jnp.zeros((Bb, H), jnp.float32)
    c = jnp.zeros((Bb, H), jnp.float32)
    hsum = jnp.zeros((Bb, H), jnp.float32)
    half = jnp.float32(0.5)

    # Fully-unrolled recurrence (T static & tiny): per step the dependent chain is
    # one bf16 MXU matmul + ONE whole-vreg tanh (EUP) + tanh(c) + a few VPU ops.
    # Gate columns were reordered to [f, i, g, o] and the g block pre-scaled by 2
    # in the wrapper, so with u = tanh(z/2):
    #   sigmoid(z_{f,i,o}) = 0.5*u + 0.5   and   tanh(z_g) = u_g
    # (one EUP push instead of the previous sigmoid(z) + tanh(z)).
    # f occupies lanes 0:H, so f*c needs no cross-lane move; the other quarter
    # extractions are static lane slices (single XLU rotates).
    for t in range(T):
        z = xz[t * Bb:(t + 1) * Bb, :] + jnp.dot(
            h.astype(jnp.bfloat16), whh, preferred_element_type=jnp.float32)  # (Bb, 4H)
        u = jnp.tanh(z * half)                                   # single EUP push
        f_g = half * u[:, 0:H] + half                            # lanes 0:H, aligned with c
        i_g = half * u[:, H:2 * H] + half
        g_g = u[:, 2 * H:3 * H]
        o_g = half * u[:, 3 * H:4 * H] + half
        c = f_g * c + i_g * g_g
        h = o_g * jnp.tanh(c)
        hsum = hsum + h

    # use_last=False branch of the module: mean over the time dimension.
    last = hsum * (1.0 / T)                                      # (Bb, H)
    wv1 = wv_out[:Bb, :]
    wv2 = wv_out[Bb:, :]

    # BatchNorm1d (eval mode) folded to y = x*s + t in the wrapper, applied per
    # segment so the classifier can use split, unpadded matmuls.
    bn_h = last * bns_h_ref[...] + bnt_h_ref[...]                # (Bb, H)
    bn_w1 = wv1 * bns_p1_ref[...] + bnt_p1_ref[...]              # (Bb, P)
    bn_w2 = wv2 * bns_p2_ref[...] + bnt_p2_ref[...]              # (Bb, P)

    parts = [bn_h, bn_w1, bn_w2]
    if Lp > L:
        parts.append(jnp.zeros((Bb, Lp - L), jnp.float32))
    fcbn_ref[...] = jnp.concatenate(parts, axis=1)               # lane-dense (Bb, Lp) store

    # Split classifier: avoids the zero-padded Lp-wide f32 dot of the previous version.
    out_ref[...] = (jnp.dot(bn_h, wfc_h_ref[...], preferred_element_type=jnp.float32)
                    + jnp.dot(bn_w1, wfc_p1_ref[...], preferred_element_type=jnp.float32)
                    + jnp.dot(bn_w2, wfc_p2_ref[...], preferred_element_type=jnp.float32)
                    + bfc_ref[...])


def rnn_forward(x, params, cfg, block_b=8):
    if cfg['rnn_model'] != 'LSTM':
        raise NotImplementedError("only the LSTM branch is implemented")
    if cfg['rnn_num_layers'] != 1:
        # TODO(synk): multi-layer LSTM stacking not implemented.
        raise NotImplementedError("rnn_num_layers > 1 not supported")
    if cfg['rnn_use_last'] or not cfg['wavelet']:
        raise NotImplementedError("config must use rnn_use_last=False, wavelet=True")

    B, T, Ctot = x.shape
    C = Ctot // 2                             # self.input_size after wavelet halving
    H = cfg['rnn_hidden_size']
    P = cfg['wavelet_output_size']
    O = cfg['output_size']
    Dw = T * C // 2                           # wvlt_size
    L = H + 2 * P
    Lp = ((L + 127) // 128) * 128             # lane-dense padded widths
    Op = ((O + 127) // 128) * 128

    # Layout assumptions the kernel comments rely on (per review): sublane-aligned
    # batch blocks and single-vreg-friendly hidden size.
    assert B % block_b == 0, "batch must be a multiple of the batch block size"
    assert block_b % 8 == 0, "batch block must be sublane (8) aligned"
    assert H % 8 == 0 and T % 2 == 0
    Bb = block_b
    nb = B // Bb

    # ---- glue: mirrors the PyTorch forward (dropout is eval-mode identity) ----
    x_rnn = x[:, :, :C]                       # splits[0]
    wvlt = x[:, :, C:2 * C]                   # splits[1]
    # per-block time-major flat slabs, bf16 MXU operands
    x_tm = jnp.transpose(x_rnn.reshape(nb, Bb, T, C), (0, 2, 1, 3))
    x_tm = x_tm.reshape(nb, T * Bb, C).astype(jnp.bfloat16)          # (nb, T*Bb, C)
    wv1_in = wvlt[:, :T // 2, :].reshape(nb, Bb, Dw)
    wv2_in = wvlt[:, T // 2:, :].reshape(nb, Bb, Dw)
    wv_stack = jnp.concatenate([wv1_in, wv2_in], axis=1).astype(jnp.bfloat16)  # (nb, 2Bb, Dw)

    # ---- weight prep ----
    def permute_scale_gates(w):
        # PyTorch gate order [i, f, g, o] -> [f, i, 2*g, o]; the 2x on g makes
        # tanh(z/2) return tanh(z_g) for the g block (single-tanh trick).
        i_g, f_g, g_g, o_g = jnp.split(w, 4, axis=-1)
        return jnp.concatenate([f_g, i_g, 2.0 * g_g, o_g], axis=-1)

    w_ih = permute_scale_gates(params['w_ih']).astype(jnp.bfloat16)   # (C, 4H)
    w_hh = permute_scale_gates(params['w_hh']).astype(jnp.bfloat16)   # (H, 4H)
    b_rnn = permute_scale_gates(params['b_rnn'])                      # (1, 4H) f32
    w_wv = params['w_wv'].astype(jnp.bfloat16)                        # (Dw, P)
    b_wv = params['b_wv']                                             # (1, P)

    # Fold eval-mode BatchNorm to y = x*s + t; split per segment (constant-sized prep).
    bn_s = params['bn_g'] * lax.rsqrt(params['bn_v'] + 1e-5)          # (1, L)
    bn_t = params['bn_b'] - params['bn_m'] * bn_s
    bns_h, bns_p1, bns_p2 = bn_s[:, :H], bn_s[:, H:H + P], bn_s[:, H + P:]
    bnt_h, bnt_p1, bnt_p2 = bn_t[:, :H], bn_t[:, H:H + P], bn_t[:, H + P:]

    # Classifier: pad columns to lane-dense Op, split rows per segment (no row padding).
    w_fc = jnp.pad(params['w_fc'], ((0, 0), (0, Op - O)))             # (L, Op)
    wfc_h, wfc_p1, wfc_p2 = w_fc[:H], w_fc[H:H + P], w_fc[H + P:]
    b_fc = jnp.pad(params['b_fc'], ((0, 0), (0, Op - O)))             # (1, Op)

    def full_spec(a):
        n = a.ndim
        return pl.BlockSpec(a.shape, lambda b, n=n: (0,) * n)

    weights = [w_ih, w_hh, b_rnn, w_wv, b_wv,
               bns_h, bnt_h, bns_p1, bnt_p1, bns_p2, bnt_p2,
               wfc_h, wfc_p1, wfc_p2, b_fc]

    in_specs = ([pl.BlockSpec((None, T * Bb, C), lambda b: (b, 0, 0)),
                 pl.BlockSpec((None, 2 * Bb, Dw), lambda b: (b, 0, 0))]
                + [full_spec(w) for w in weights])
    out_specs = (pl.BlockSpec((Bb, Op), lambda b: (b, 0)),
                 pl.BlockSpec((Bb, Lp), lambda b: (b, 0)))

    out_p, fcbn_p = pl.pallas_call(
        rnn_forward_kernel,
        out_shape=(jax.ShapeDtypeStruct((B, Op), jnp.float32),
                   jax.ShapeDtypeStruct((B, Lp), jnp.float32)),
        grid=(nb,),
        in_specs=in_specs,
        out_specs=out_specs,
        # independent batch blocks: megacore-shardable (uses both TCs on v7x)
        compiler_params=pltpu.CompilerParams(dimension_semantics=("parallel",)),
    )(x_tm, wv_stack, *weights)

    out = out_p[:, :O]
    fc_bn = fcbn_p[:, :L]
    # NOTE: the 'neg:' key (with trailing colon) intentionally mirrors the original
    # PyTorch module's returned dict.
    return out, {'orig': fc_bn, 'pos': None, 'neg:': None}


def rnn_forward_ref(x, params, cfg):
    """Pure-JAX f32 reference (mirrors PyTorch semantics) for correctness check."""
    B, T, _ = x.shape
    C = cfg['input_channels'] // 2
    H = cfg['rnn_hidden_size']

    x_rnn = x[:, :, :C]
    wvlt = x[:, :, C:2 * C]
    wv1_in = wvlt[:, :T // 2, :].reshape(B, -1)
    wv2_in = wvlt[:, T // 2:, :].reshape(B, -1)
    x_tm = jnp.transpose(x_rnn, (1, 0, 2))

    def step(carry, x_t):
        h, c = carry
        z = x_t @ params['w_ih'] + h @ params['w_hh'] + params['b_rnn'][0]
        i = jax.nn.sigmoid(z[:, :H])
        f = jax.nn.sigmoid(z[:, H:2 * H])
        g = jnp.tanh(z[:, 2 * H:3 * H])
        o = jax.nn.sigmoid(z[:, 3 * H:4 * H])
        c = f * c + i * g
        h = o * jnp.tanh(c)
        return (h, c), h

    init = (jnp.zeros((B, H), jnp.float32), jnp.zeros((B, H), jnp.float32))
    _, hs = lax.scan(step, init, x_tm)
    last = hs.mean(axis=0)

    wv1 = wv1_in @ params['w_wv'] + params['b_wv'][0]
    wv2 = wv2_in @ params['w_wv'] + params['b_wv'][0]
    fc_in = jnp.concatenate([last, wv1, wv2], axis=1)
    fc_bn = (fc_in - params['bn_m']) / jnp.sqrt(params['bn_v'] + 1e-5) * params['bn_g'] + params['bn_b']
    out = fc_bn @ params['w_fc'] + params['b_fc'][0]
    return out, fc_bn


if __name__ == "__main__":
    cfg = dict(input_channels=8, output_size=8, rnn_model='LSTM',
               rnn_use_last=False, rnn_hidden_size=32, rnn_num_layers=1,
               dropout=0.0, input_length=16, wavelet=True,
               wavelet_output_size=16)

    B = 16                                   # 2 batch blocks of 8 -> exercises the grid
    T = cfg['input_length']
    Ctot = cfg['input_channels']
    C = Ctot // 2
    H = cfg['rnn_hidden_size']
    P = cfg['wavelet_output_size']
    O = cfg['output_size']
    L = H + 2 * P
    Dw = T * C // 2                          # wvlt_size

    key = jax.random.PRNGKey(0)
    ks = jax.random.split(key, 12)
    s = 0.1
    params = {
        'w_ih': s * jax.random.normal(ks[0], (C, 4 * H), jnp.float32),
        'w_hh': s * jax.random.normal(ks[1], (H, 4 * H), jnp.float32),
        'b_rnn': s * jax.random.normal(ks[2], (1, 4 * H), jnp.float32),  # b_ih + b_hh combined
        'w_wv': s * jax.random.normal(ks[3], (Dw, P), jnp.float32),
        'b_wv': s * jax.random.normal(ks[4], (1, P), jnp.float32),
        'bn_g': 1.0 + 0.1 * jax.random.normal(ks[5], (1, L), jnp.float32),
        'bn_b': 0.1 * jax.random.normal(ks[6], (1, L), jnp.float32),
        'bn_m': 0.1 * jax.random.normal(ks[7], (1, L), jnp.float32),
        'bn_v': 1.0 + 0.1 * jax.random.uniform(ks[8], (1, L), jnp.float32),
        'w_fc': s * jax.random.normal(ks[9], (L, O), jnp.float32),
        'b_fc': s * jax.random.normal(ks[10], (1, O), jnp.float32),
    }
    x = jax.random.normal(ks[11], (B, T, Ctot), jnp.float32)

    out, extras = rnn_forward(x, params, cfg, block_b=8)
    out = jax.block_until_ready(out)
    fc_bn = jax.block_until_ready(extras['orig'])

    out_ref, fc_bn_ref = rnn_forward_ref(x, params, cfg)
    assert out.shape == (B, O) and fc_bn.shape == (B, L)
    # tolerance accounts for bf16 MXU operands in the recurrence and wavelet branch
    # (f32 accumulation) plus the tanh-form sigmoid rewrite.
    assert jnp.allclose(out, out_ref, atol=3e-2, rtol=3e-2)
    assert jnp.allclose(fc_bn, fc_bn_ref, atol=3e-2, rtol=3e-2)

    print("KERNEL_OK")
</pallas_src>

<mosaic_0001>
module attributes {stable_mosaic.version = 11 : i64} {
  func.func @rnn_forward_kernel(%arg0: i32, %arg1: memref<1x128x4xbf16, #tpu.memory_space<vmem>>, %arg2: memref<1x16x32xbf16, #tpu.memory_space<vmem>>, %arg3: memref<4x128xbf16, #tpu.memory_space<vmem>>, %arg4: memref<32x128xbf16, #tpu.memory_space<vmem>>, %arg5: memref<1x128xf32, #tpu.memory_space<vmem>>, %arg6: memref<32x16xbf16, #tpu.memory_space<vmem>>, %arg7: memref<1x16xf32, #tpu.memory_space<vmem>>, %arg8: memref<1x32xf32, #tpu.memory_space<vmem>>, %arg9: memref<1x32xf32, #tpu.memory_space<vmem>>, %arg10: memref<1x16xf32, #tpu.memory_space<vmem>>, %arg11: memref<1x16xf32, #tpu.memory_space<vmem>>, %arg12: memref<1x16xf32, #tpu.memory_space<vmem>>, %arg13: memref<1x16xf32, #tpu.memory_space<vmem>>, %arg14: memref<32x128xf32, #tpu.memory_space<vmem>>, %arg15: memref<16x128xf32, #tpu.memory_space<vmem>>, %arg16: memref<16x128xf32, #tpu.memory_space<vmem>>, %arg17: memref<1x128xf32, #tpu.memory_space<vmem>>, %arg18: memref<8x128xf32, #tpu.memory_space<vmem>>, %arg19: memref<8x128xf32, #tpu.memory_space<vmem>>) attributes {dimension_semantics = [#tpu.dimension_semantics<parallel>], iteration_bounds = array<i64: 2>, scalar_prefetch = 0 : i64, scratch_operands = 0 : i64, tpu.core_type = #tpu.core_type<tc>, window_params = [{transform_indices = @transform_0, window_bounds = array<i64: 1, 128, 4>}, {transform_indices = @transform_1, window_bounds = array<i64: 1, 16, 32>}, {pipeline_mode = #tpu.pipeline_mode<synchronous>, transform_indices = @transform_2, window_bounds = array<i64: 4, 128>}, {pipeline_mode = #tpu.pipeline_mode<synchronous>, transform_indices = @transform_3, window_bounds = array<i64: 32, 128>}, {pipeline_mode = #tpu.pipeline_mode<synchronous>, transform_indices = @transform_4, window_bounds = array<i64: 1, 128>}, {pipeline_mode = #tpu.pipeline_mode<synchronous>, transform_indices = @transform_5, window_bounds = array<i64: 32, 16>}, {pipeline_mode = #tpu.pipeline_mode<synchronous>, transform_indices = @transform_6, window_bounds = array<i64: 1, 16>}, {pipeline_mode = #tpu.pipeline_mode<synchronous>, transform_indices = @transform_7, window_bounds = array<i64: 1, 32>}, {pipeline_mode = #tpu.pipeline_mode<synchronous>, transform_indices = @transform_8, window_bounds = array<i64: 1, 32>}, {pipeline_mode = #tpu.pipeline_mode<synchronous>, transform_indices = @transform_9, window_bounds = array<i64: 1, 16>}, {pipeline_mode = #tpu.pipeline_mode<synchronous>, transform_indices = @transform_10, window_bounds = array<i64: 1, 16>}, {pipeline_mode = #tpu.pipeline_mode<synchronous>, transform_indices = @transform_11, window_bounds = array<i64: 1, 16>}, {pipeline_mode = #tpu.pipeline_mode<synchronous>, transform_indices = @transform_12, window_bounds = array<i64: 1, 16>}, {pipeline_mode = #tpu.pipeline_mode<synchronous>, transform_indices = @transform_13, window_bounds = array<i64: 32, 128>}, {pipeline_mode = #tpu.pipeline_mode<synchronous>, transform_indices = @transform_14, window_bounds = array<i64: 16, 128>}, {pipeline_mode = #tpu.pipeline_mode<synchronous>, transform_indices = @transform_15, window_bounds = array<i64: 16, 128>}, {pipeline_mode = #tpu.pipeline_mode<synchronous>, transform_indices = @transform_16, window_bounds = array<i64: 1, 128>}, {transform_indices = @transform_17, window_bounds = array<i64: 8, 128>}, {transform_indices = @transform_18, window_bounds = array<i64: 8, 128>}]} {
    %c0 = arith.constant 0 : index
    %c0_0 = arith.constant 0 : index
    %c0_1 = arith.constant 0 : index
    %0 = vector.load %arg2[%c0, %c0_0, %c0_1] : memref<1x16x32xbf16, #tpu.memory_space<vmem>>, vector<1x16x32xbf16>
    %1 = vector.shape_cast %0 : vector<1x16x32xbf16> to vector<16x32xbf16>
    %c0_2 = arith.constant 0 : index
    %c0_3 = arith.constant 0 : index
    %2 = vector.load %arg6[%c0_2, %c0_3] : memref<32x16xbf16, #tpu.memory_space<vmem>>, vector<32x16xbf16>
    %cst = arith.constant dense<0.000000e+00> : vector<16x16xf32>
    %3 = tpu.matmul %1, %2, %cst {dimension_numbers = #tpu.dot_dimension_numbers<[1], [0], [0], [1], [0, 0, 1, 1], [], []>} : vector<16x32xbf16>, vector<32x16xbf16>, vector<16x16xf32> -> vector<16x16xf32>
    %c0_4 = arith.constant 0 : index
    %c0_5 = arith.constant 0 : index
    %4 = vector.load %arg7[%c0_4, %c0_5] : memref<1x16xf32, #tpu.memory_space<vmem>>, vector<1x16xf32>
    %5 = vector.broadcast %4 : vector<1x16xf32> to vector<16x16xf32>
    %6 = arith.addf %3, %5 : vector<16x16xf32>
    %c0_6 = arith.constant 0 : index
    %c0_7 = arith.constant 0 : index
    %c0_8 = arith.constant 0 : index
    %7 = vector.load %arg1[%c0_6, %c0_7, %c0_8] : memref<1x128x4xbf16, #tpu.memory_space<vmem>>, vector<1x128x4xbf16>
    %8 = vector.shape_cast %7 : vector<1x128x4xbf16> to vector<128x4xbf16>
    %c0_9 = arith.constant 0 : index
    %c0_10 = arith.constant 0 : index
    %9 = vector.load %arg3[%c0_9, %c0_10] : memref<4x128xbf16, #tpu.memory_space<vmem>>, vector<4x128xbf16>
    %cst_11 = arith.constant dense<0.000000e+00> : vector<128x128xf32>
    %10 = tpu.matmul %8, %9, %cst_11 {dimension_numbers = #tpu.dot_dimension_numbers<[1], [0], [0], [1], [0, 0, 1, 1], [], []>} : vector<128x4xbf16>, vector<4x128xbf16>, vector<128x128xf32> -> vector<128x128xf32>
    %c0_12 = arith.constant 0 : index
    %c0_13 = arith.constant 0 : index
    %11 = vector.load %arg5[%c0_12, %c0_13] : memref<1x128xf32, #tpu.memory_space<vmem>>, vector<1x128xf32>
    %12 = vector.broadcast %11 : vector<1x128xf32> to vector<128x128xf32>
    %13 = arith.addf %10, %12 : vector<128x128xf32>
    %c0_14 = arith.constant 0 : index
    %c0_15 = arith.constant 0 : index
    %14 = vector.load %arg4[%c0_14, %c0_15] : memref<32x128xbf16, #tpu.memory_space<vmem>>, vector<32x128xbf16>
    %cst_16 = arith.constant 0.000000e+00 : f32
    %15 = vector.broadcast %cst_16 : f32 to vector<8x32xf32>
    %cst_17 = arith.constant 0.000000e+00 : f32
    %16 = vector.broadcast %cst_17 : f32 to vector<8x32xf32>
    %cst_18 = arith.constant 0.000000e+00 : f32
    %17 = vector.broadcast %cst_18 : f32 to vector<8x32xf32>
    %18 = vector.extract_strided_slice %13 {offsets = [0, 0], sizes = [8, 128], strides = [1, 1]} : vector<128x128xf32> to vector<8x128xf32>
    %19 = arith.truncf %15 : vector<8x32xf32> to vector<8x32xbf16>
    %cst_19 = arith.constant dense<0.000000e+00> : vector<8x128xf32>
    %20 = tpu.matmul %19, %14, %cst_19 {dimension_numbers = #tpu.dot_dimension_numbers<[1], [0], [0], [1], [0, 0, 1, 1], [], []>} : vector<8x32xbf16>, vector<32x128xbf16>, vector<8x128xf32> -> vector<8x128xf32>
    %21 = arith.addf %18, %20 : vector<8x128xf32>
    %cst_20 = arith.constant 5.000000e-01 : f32
    %22 = vector.broadcast %cst_20 : f32 to vector<8x128xf32>
    %23 = arith.mulf %21, %22 : vector<8x128xf32>
    %24 = math.tanh %23 : vector<8x128xf32>
    %25 = vector.extract_strided_slice %24 {offsets = [0, 0], sizes = [8, 32], strides = [1, 1]} : vector<8x128xf32> to vector<8x32xf32>
    %cst_21 = arith.constant 5.000000e-01 : f32
    %26 = vector.broadcast %cst_21 : f32 to vector<8x32xf32>
    %27 = arith.mulf %26, %25 : vector<8x32xf32>
    %cst_22 = arith.constant 5.000000e-01 : f32
    %28 = vector.broadcast %cst_22 : f32 to vector<8x32xf32>
    %29 = arith.addf %27, %28 : vector<8x32xf32>
    %30 = vector.extract_strided_slice %24 {offsets = [0, 32], sizes = [8, 32], strides = [1, 1]} : vector<8x128xf32> to vector<8x32xf32>
    %cst_23 = arith.constant 5.000000e-01 : f32
    %31 = vector.broadcast %cst_23 : f32 to vector<8x32xf32>
    %32 = arith.mulf %31, %30 : vector<8x32xf32>
    %cst_24 = arith.constant 5.000000e-01 : f32
    %33 = vector.broadcast %cst_24 : f32 to vector<8x32xf32>
    %34 = arith.addf %32, %33 : vector<8x32xf32>
    %35 = vector.extract_strided_slice %24 {offsets = [0, 64], sizes = [8, 32], strides = [1, 1]} : vector<8x128xf32> to vector<8x32xf32>
    %36 = vector.extract_strided_slice %24 {offsets = [0, 96], sizes = [8, 32], strides = [1, 1]} : vector<8x128xf32> to vector<8x32xf32>
    %cst_25 = arith.constant 5.000000e-01 : f32
    %37 = vector.broadcast %cst_25 : f32 to vector<8x32xf32>
    %38 = arith.mulf %37, %36 : vector<8x32xf32>
    %cst_26 = arith.constant 5.000000e-01 : f32
    %39 = vector.broadcast %cst_26 : f32 to vector<8x32xf32>
    %40 = arith.addf %38, %39 : vector<8x32xf32>
    %41 = arith.mulf %29, %16 : vector<8x32xf32>
    %42 = arith.mulf %34, %35 : vector<8x32xf32>
    %43 = arith.addf %41, %42 : vector<8x32xf32>
    %44 = math.tanh %43 : vector<8x32xf32>
    %45 = arith.mulf %40, %44 : vector<8x32xf32>
    %46 = arith.addf %17, %45 : vector<8x32xf32>
    %47 = vector.extract_strided_slice %13 {offsets = [8, 0], sizes = [8, 128], strides = [1, 1]} : vector<128x128xf32> to vector<8x128xf32>
    %48 = arith.truncf %45 : vector<8x32xf32> to vector<8x32xbf16>
    %cst_27 = arith.constant dense<0.000000e+00> : vector<8x128xf32>
    %49 = tpu.matmul %48, %14, %cst_27 {dimension_numbers = #tpu.dot_dimension_numbers<[1], [0], [0], [1], [0, 0, 1, 1], [], []>} : vector<8x32xbf16>, vector<32x128xbf16>, vector<8x128xf32> -> vector<8x128xf32>
    %50 = arith.addf %47, %49 : vector<8x128xf32>
    %cst_28 = arith.constant 5.000000e-01 : f32
    %51 = vector.broadcast %cst_28 : f32 to vector<8x128xf32>
    %52 = arith.mulf %50, %51 : vector<8x128xf32>
    %53 = math.tanh %52 : vector<8x128xf32>
    %54 = vector.extract_strided_slice %53 {offsets = [0, 0], sizes = [8, 32], strides = [1, 1]} : vector<8x128xf32> to vector<8x32xf32>
    %cst_29 = arith.constant 5.000000e-01 : f32
    %55 = vector.broadcast %cst_29 : f32 to vector<8x32xf32>
    %56 = arith.mulf %55, %54 : vector<8x32xf32>
    %cst_30 = arith.constant 5.000000e-01 : f32
    %57 = vector.broadcast %cst_30 : f32 to vector<8x32xf32>
    %58 = arith.addf %56, %57 : vector<8x32xf32>
    %59 = vector.extract_strided_slice %53 {offsets = [0, 32], sizes = [8, 32], strides = [1, 1]} : vector<8x128xf32> to vector<8x32xf32>
    %cst_31 = arith.constant 5.000000e-01 : f32
    %60 = vector.broadcast %cst_31 : f32 to vector<8x32xf32>
    %61 = arith.mulf %60, %59 : vector<8x32xf32>
    %cst_32 = arith.constant 5.000000e-01 : f32
    %62 = vector.broadcast %cst_32 : f32 to vector<8x32xf32>
    %63 = arith.addf %61, %62 : vector<8x32xf32>
    %64 = vector.extract_strided_slice %53 {offsets = [0, 64], sizes = [8, 32], strides = [1, 1]} : vector<8x128xf32> to vector<8x32xf32>
    %65 = vector.extract_strided_slice %53 {offsets = [0, 96], sizes = [8, 32], strides = [1, 1]} : vector<8x128xf32> to vector<8x32xf32>
    %cst_33 = arith.constant 5.000000e-01 : f32
    %66 = vector.broadcast %cst_33 : f32 to vector<8x32xf32>
    %67 = arith.mulf %66, %65 : vector<8x32xf32>
    %cst_34 = arith.constant 5.000000e-01 : f32
    %68 = vector.broadcast %cst_34 : f32 to vector<8x32xf32>
    %69 = arith.addf %67, %68 : vector<8x32xf32>
    %70 = arith.mulf %58, %43 : vector<8x32xf32>
    %71 = arith.mulf %63, %64 : vector<8x32xf32>
    %72 = arith.addf %70, %71 : vector<8x32xf32>
    %73 = math.tanh %72 : vector<8x32xf32>
    %74 = arith.mulf %69, %73 : vector<8x32xf32>
    %75 = arith.addf %46, %74 : vector<8x32xf32>
    %76 = vector.extract_strided_slice %13 {offsets = [16, 0], sizes = [8, 128], strides = [1, 1]} : vector<128x128xf32> to vector<8x128xf32>
    %77 = arith.truncf %74 : vector<8x32xf32> to vector<8x32xbf16>
    %cst_35 = arith.constant dense<0.000000e+00> : vector<8x128xf32>
    %78 = tpu.matmul %77, %14, %cst_35 {dimension_numbers = #tpu.dot_dimension_numbers<[1], [0], [0], [1], [0, 0, 1, 1], [], []>} : vector<8x32xbf16>, vector<32x128xbf16>, vector<8x128xf32> -> vector<8x128xf32>
    %79 = arith.addf %76, %78 : vector<8x128xf32>
    %cst_36 = arith.constant 5.000000e-01 : f32
    %80 = vector.broadcast %cst_36 : f32 to vector<8x128xf32>
    %81 = arith.mulf %79, %80 : vector<8x128xf32>
    %82 = math.tanh %81 : vector<8x128xf32>
    %83 = vector.extract_strided_slice %82 {offsets = [0, 0], sizes = [8, 32], strides = [1, 1]} : vector<8x128xf32> to vector<8x32xf32>
    %cst_37 = arith.constant 5.000000e-01 : f32
    %84 = vector.broadcast %cst_37 : f32 to vector<8x32xf32>
    %85 = arith.mulf %84, %83 : vector<8x32xf32>
    %cst_38 = arith.constant 5.000000e-01 : f32
    %86 = vector.broadcast %cst_38 : f32 to vector<8x32xf32>
    %87 = arith.addf %85, %86 : vector<8x32xf32>
    %88 = vector.extract_strided_slice %82 {offsets = [0, 32], sizes = [8, 32], strides = [1, 1]} : vector<8x128xf32> to vector<8x32xf32>
    %cst_39 = arith.constant 5.000000e-01 : f32
    %89 = vector.broadcast %cst_39 : f32 to vector<8x32xf32>
    %90 = arith.mulf %89, %88 : vector<8x32xf32>
    %cst_40 = arith.constant 5.000000e-01 : f32
    %91 = vector.broadcast %cst_40 : f32 to vector<8x32xf32>
    %92 = arith.addf %90, %91 : vector<8x32xf32>
    %93 = vector.extract_strided_slice %82 {offsets = [0, 64], sizes = [8, 32], strides = [1, 1]} : vector<8x128xf32> to vector<8x32xf32>
    %94 = vector.extract_strided_slice %82 {offsets = [0, 96], sizes = [8, 32], strides = [1, 1]} : vector<8x128xf32> to vector<8x32xf32>
    %cst_41 = arith.constant 5.000000e-01 : f32
    %95 = vector.broadcast %cst_41 : f32 to vector<8x32xf32>
    %96 = arith.mulf %95, %94 : vector<8x32xf32>
    %cst_42 = arith.constant 5.000000e-01 : f32
    %97 = vector.broadcast %cst_42 : f32 to vector<8x32xf32>
    %98 = arith.addf %96, %97 : vector<8x32xf32>
    %99 = arith.mulf %87, %72 : vector<8x32xf32>
    %100 = arith.mulf %92, %93 : vector<8x32xf32>
    %101 = arith.addf %99, %100 : vector<8x32xf32>
    %102 = math.tanh %101 : vector<8x32xf32>
    %103 = arith.mulf %98, %102 : vector<8x32xf32>
    %104 = arith.addf %75, %103 : vector<8x32xf32>
    %105 = vector.extract_strided_slice %13 {offsets = [24, 0], sizes = [8, 128], strides = [1, 1]} : vector<128x128xf32> to vector<8x128xf32>
    %106 = arith.truncf %103 : vector<8x32xf32> to vector<8x32xbf16>
    %cst_43 = arith.constant dense<0.000000e+00> : vector<8x128xf32>
    %107 = tpu.matmul %106, %14, %cst_43 {dimension_numbers = #tpu.dot_dimension_numbers<[1], [0], [0], [1], [0, 0, 1, 1], [], []>} : vector<8x32xbf16>, vector<32x128xbf16>, vector<8x128xf32> -> vector<8x128xf32>
    %108 = arith.addf %105, %107 : vector<8x128xf32>
    %cst_44 = arith.constant 5.000000e-01 : f32
    %109 = vector.broadcast %cst_44 : f32 to vector<8x128xf32>
    %110 = arith.mulf %108, %109 : vector<8x128xf32>
    %111 = math.tanh %110 : vector<8x128xf32>
    %112 = vector.extract_strided_slice %111 {offsets = [0, 0], sizes = [8, 32], strides = [1, 1]} : vector<8x128xf32> to vector<8x32xf32>
    %cst_45 = arith.constant 5.000000e-01 : f32
    %113 = vector.broadcast %cst_45 : f32 to vector<8x32xf32>
    %114 = arith.mulf %113, %112 : vector<8x32xf32>
    %cst_46 = arith.constant 5.000000e-01 : f32
    %115 = vector.broadcast %cst_46 : f32 to vector<8x32xf32>
    %116 = arith.addf %114, %115 : vector<8x32xf32>
    %117 = vector.extract_strided_slice %111 {offsets = [0, 32], sizes = [8, 32], strides = [1, 1]} : vector<8x128xf32> to vector<8x32xf32>
    %cst_47 = arith.constant 5.000000e-01 : f32
    %118 = vector.broadcast %cst_47 : f32 to vector<8x32xf32>
    %119 = arith.mulf %118, %117 : vector<8x32xf32>
    %cst_48 = arith.constant 5.000000e-01 : f32
    %120 = vector.broadcast %cst_48 : f32 to vector<8x32xf32>
    %121 = arith.addf %119, %120 : vector<8x32xf32>
    %122 = vector.extract_strided_slice %111 {offsets = [0, 64], sizes = [8, 32], strides = [1, 1]} : vector<8x128xf32> to vector<8x32xf32>
    %123 = vector.extract_strided_slice %111 {offsets = [0, 96], sizes = [8, 32], strides = [1, 1]} : vector<8x128xf32> to vector<8x32xf32>
    %cst_49 = arith.constant 5.000000e-01 : f32
    %124 = vector.broadcast %cst_49 : f32 to vector<8x32xf32>
    %125 = arith.mulf %124, %123 : vector<8x32xf32>
    %cst_50 = arith.constant 5.000000e-01 : f32
    %126 = vector.broadcast %cst_50 : f32 to vector<8x32xf32>
    %127 = arith.addf %125, %126 : vector<8x32xf32>
    %128 = arith.mulf %116, %101 : vector<8x32xf32>
    %129 = arith.mulf %121, %122 : vector<8x32xf32>
    %130 = arith.addf %128, %129 : vector<8x32xf32>
    %131 = math.tanh %130 : vector<8x32xf32>
    %132 = arith.mulf %127, %131 : vector<8x32xf32>
    %133 = arith.addf %104, %132 : vector<8x32xf32>
    %134 = vector.extract_strided_slice %13 {offsets = [32, 0], sizes = [8, 128], strides = [1, 1]} : vector<128x128xf32> to vector<8x128xf32>
    %135 = arith.truncf %132 : vector<8x32xf32> to vector<8x32xbf16>
    %cst_51 = arith.constant dense<0.000000e+00> : vector<8x128xf32>
    %136 = tpu.matmul %135, %14, %cst_51 {dimension_numbers = #tpu.dot_dimension_numbers<[1], [0], [0], [1], [0, 0, 1, 1], [], []>} : vector<8x32xbf16>, vector<32x128xbf16>, vector<8x128xf32> -> vector<8x128xf32>
    %137 = arith.addf %134, %136 : vector<8x128xf32>
    %cst_52 = arith.constant 5.000000e-01 : f32
    %138 = vector.broadcast %cst_52 : f32 to vector<8x128xf32>
    %139 = arith.mulf %137, %138 : vector<8x128xf32>
    %140 = math.tanh %139 : vector<8x128xf32>
    %141 = vector.extract_strided_slice %140 {offsets = [0, 0], sizes = [8, 32], strides = [1, 1]} : vector<8x128xf32> to vector<8x32xf32>
    %cst_53 = arith.constant 5.000000e-01 : f32
    %142 = vector.broadcast %cst_53 : f32 to vector<8x32xf32>
    %143 = arith.mulf %142, %141 : vector<8x32xf32>
    %cst_54 = arith.constant 5.000000e-01 : f32
    %144 = vector.broadcast %cst_54 : f32 to vector<8x32xf32>
    %145 = arith.addf %143, %144 : vector<8x32xf32>
    %146 = vector.extract_strided_slice %140 {offsets = [0, 32], sizes = [8, 32], strides = [1, 1]} : vector<8x128xf32> to vector<8x32xf32>
    %cst_55 = arith.constant 5.000000e-01 : f32
    %147 = vector.broadcast %cst_55 : f32 to vector<8x32xf32>
    %148 = arith.mulf %147, %146 : vector<8x32xf32>
    %cst_56 = arith.constant 5.000000e-01 : f32
    %149 = vector.broadcast %cst_56 : f32 to vector<8x32xf32>
    %150 = arith.addf %148, %149 : vector<8x32xf32>
    %151 = vector.extract_strided_slice %140 {offsets = [0, 64], sizes = [8, 32], strides = [1, 1]} : vector<8x128xf32> to vector<8x32xf32>
    %152 = vector.extract_strided_slice %140 {offsets = [0, 96], sizes = [8, 32], strides = [1, 1]} : vector<8x128xf32> to vector<8x32xf32>
    %cst_57 = arith.constant 5.000000e-01 : f32
    %153 = vector.broadcast %cst_57 : f32 to vector<8x32xf32>
    %154 = arith.mulf %153, %152 : vector<8x32xf32>
    %cst_58 = arith.constant 5.000000e-01 : f32
    %155 = vector.broadcast %cst_58 : f32 to vector<8x32xf32>
    %156 = arith.addf %154, %155 : vector<8x32xf32>
    %157 = arith.mulf %145, %130 : vector<8x32xf32>
    %158 = arith.mulf %150, %151 : vector<8x32xf32>
    %159 = arith.addf %157, %158 : vector<8x32xf32>
    %160 = math.tanh %159 : vector<8x32xf32>
    %161 = arith.mulf %156, %160 : vector<8x32xf32>
    %162 = arith.addf %133, %161 : vector<8x32xf32>
    %163 = vector.extract_strided_slice %13 {offsets = [40, 0], sizes = [8, 128], strides = [1, 1]} : vector<128x128xf32> to vector<8x128xf32>
    %164 = arith.truncf %161 : vector<8x32xf32> to vector<8x32xbf16>
    %cst_59 = arith.constant dense<0.000000e+00> : vector<8x128xf32>
    %165 = tpu.matmul %164, %14, %cst_59 {dimension_numbers = #tpu.dot_dimension_numbers<[1], [0], [0], [1], [0, 0, 1, 1], [], []>} : vector<8x32xbf16>, vector<32x128xbf16>, vector<8x128xf32> -> vector<8x128xf32>
    %166 = arith.addf %163, %165 : vector<8x128xf32>
    %cst_60 = arith.constant 5.000000e-01 : f32
    %167 = vector.broadcast %cst_60 : f32 to vector<8x128xf32>
    %168 = arith.mulf %166, %167 : vector<8x128xf32>
    %169 = math.tanh %168 : vector<8x128xf32>
    %170 = vector.extract_strided_slice %169 {offsets = [0, 0], sizes = [8, 32], strides = [1, 1]} : vector<8x128xf32> to vector<8x32xf32>
    %cst_61 = arith.constant 5.000000e-01 : f32
    %171 = vector.broadcast %cst_61 : f32 to vector<8x32xf32>
    %172 = arith.mulf %171, %170 : vector<8x32xf32>
    %cst_62 = arith.constant 5.000000e-01 : f32
    %173 = vector.broadcast %cst_62 : f32 to vector<8x32xf32>
    %174 = arith.addf %172, %173 : vector<8x32xf32>
    %175 = vector.extract_strided_slice %169 {offsets = [0, 32], sizes = [8, 32], strides = [1, 1]} : vector<8x128xf32> to vector<8x32xf32>
    %cst_63 = arith.constant 5.000000e-01 : f32
    %176 = vector.broadcast %cst_63 : f32 to vector<8x32xf32>
    %177 = arith.mulf %176, %175 : vector<8x32xf32>
    %cst_64 = arith.constant 5.000000e-01 : f32
    %178 = vector.broadcast %cst_64 : f32 to vector<8x32xf32>
    %179 = arith.addf %177, %178 : vector<8x32xf32>
    %180 = vector.extract_strided_slice %169 {offsets = [0, 64], sizes = [8, 32], strides = [1, 1]} : vector<8x128xf32> to vector<8x32xf32>
    %181 = vector.extract_strided_slice %169 {offsets = [0, 96], sizes = [8, 32], strides = [1, 1]} : vector<8x128xf32> to vector<8x32xf32>
    %cst_65 = arith.constant 5.000000e-01 : f32
    %182 = vector.broadcast %cst_65 : f32 to vector<8x32xf32>
    %183 = arith.mulf %182, %181 : vector<8x32xf32>
    %cst_66 = arith.constant 5.000000e-01 : f32
    %184 = vector.broadcast %cst_66 : f32 to vector<8x32xf32>
    %185 = arith.addf %183, %184 : vector<8x32xf32>
    %186 = arith.mulf %174, %159 : vector<8x32xf32>
    %187 = arith.mulf %179, %180 : vector<8x32xf32>
    %188 = arith.addf %186, %187 : vector<8x32xf32>
    %189 = math.tanh %188 : vector<8x32xf32>
    %190 = arith.mulf %185, %189 : vector<8x32xf32>
    %191 = arith.addf %162, %190 : vector<8x32xf32>
    %192 = vector.extract_strided_slice %13 {offsets = [48, 0], sizes = [8, 128], strides = [1, 1]} : vector<128x128xf32> to vector<8x128xf32>
    %193 = arith.truncf %190 : vector<8x32xf32> to vector<8x32xbf16>
    %cst_67 = arith.constant dense<0.000000e+00> : vector<8x128xf32>
    %194 = tpu.matmul %193, %14, %cst_67 {dimension_numbers = #tpu.dot_dimension_numbers<[1], [0], [0], [1], [0, 0, 1, 1], [], []>} : vector<8x32xbf16>, vector<32x128xbf16>, vector<8x128xf32> -> vector<8x128xf32>
    %195 = arith.addf %192, %194 : vector<8x128xf32>
    %cst_68 = arith.constant 5.000000e-01 : f32
    %196 = vector.broadcast %cst_68 : f32 to vector<8x128xf32>
    %197 = arith.mulf %195, %196 : vector<8x128xf32>
    %198 = math.tanh %197 : vector<8x128xf32>
    %199 = vector.extract_strided_slice %198 {offsets = [0, 0], sizes = [8, 32], strides = [1, 1]} : vector<8x128xf32> to vector<8x32xf32>
    %cst_69 = arith.constant 5.000000e-01 : f32
    %200 = vector.broadcast %cst_69 : f32 to vector<8x32xf32>
    %201 = arith.mulf %200, %199 : vector<8x32xf32>
    %cst_70 = arith.constant 5.000000e-01 : f32
    %202 = vector.broadcast %cst_70 : f32 to vector<8x32xf32>
    %203 = arith.addf %201, %202 : vector<8x32xf32>
    %204 = vector.extract_strided_slice %198 {offsets = [0, 32], sizes = [8, 32], strides = [1, 1]} : vector<8x128xf32> to vector<8x32xf32>
    %cst_71 = arith.constant 5.000000e-01 : f32
    %205 = vector.broadcast %cst_71 : f32 to vector<8x32xf32>
    %206 = arith.mulf %205, %204 : vector<8x32xf32>
    %cst_72 = arith.constant 5.000000e-01 : f32
    %207 = vector.broadcast %cst_72 : f32 to vector<8x32xf32>
    %208 = arith.addf %206, %207 : vector<8x32xf32>
    %209 = vector.extract_strided_slice %198 {offsets = [0, 64], sizes = [8, 32], strides = [1, 1]} : vector<8x128xf32> to vector<8x32xf32>
    %210 = vector.extract_strided_slice %198 {offsets = [0, 96], sizes = [8, 32], strides = [1, 1]} : vector<8x128xf32> to vector<8x32xf32>
    %cst_73 = arith.constant 5.000000e-01 : f32
    %211 = vector.broadcast %cst_73 : f32 to vector<8x32xf32>
    %212 = arith.mulf %211, %210 : vector<8x32xf32>
    %cst_74 = arith.constant 5.000000e-01 : f32
    %213 = vector.broadcast %cst_74 : f32 to vector<8x32xf32>
    %214 = arith.addf %212, %213 : vector<8x32xf32>
    %215 = arith.mulf %203, %188 : vector<8x32xf32>
    %216 = arith.mulf %208, %209 : vector<8x32xf32>
    %217 = arith.addf %215, %216 : vector<8x32xf32>
    %218 = math.tanh %217 : vector<8x32xf32>
    %219 = arith.mulf %214, %218 : vector<8x32xf32>
    %220 = arith.addf %191, %219 : vector<8x32xf32>
    %221 = vector.extract_strided_slice %13 {offsets = [56, 0], sizes = [8, 128], strides = [1, 1]} : vector<128x128xf32> to vector<8x128xf32>
    %222 = arith.truncf %219 : vector<8x32xf32> to vector<8x32xbf16>
    %cst_75 = arith.constant dense<0.000000e+00> : vector<8x128xf32>
    %223 = tpu.matmul %222, %14, %cst_75 {dimension_numbers = #tpu.dot_dimension_numbers<[1], [0], [0], [1], [0, 0, 1, 1], [], []>} : vector<8x32xbf16>, vector<32x128xbf16>, vector<8x128xf32> -> vector<8x128xf32>
    %224 = arith.addf %221, %223 : vector<8x128xf32>
    %cst_76 = arith.constant 5.000000e-01 : f32
    %225 = vector.broadcast %cst_76 : f32 to vector<8x128xf32>
    %226 = arith.mulf %224, %225 : vector<8x128xf32>
    %227 = math.tanh %226 : vector<8x128xf32>
    %228 = vector.extract_strided_slice %227 {offsets = [0, 0], sizes = [8, 32], strides = [1, 1]} : vector<8x128xf32> to vector<8x32xf32>
    %cst_77 = arith.constant 5.000000e-01 : f32
    %229 = vector.broadcast %cst_77 : f32 to vector<8x32xf32>
    %230 = arith.mulf %229, %228 : vector<8x32xf32>
    %cst_78 = arith.constant 5.000000e-01 : f32
    %231 = vector.broadcast %cst_78 : f32 to vector<8x32xf32>
    %232 = arith.addf %230, %231 : vector<8x32xf32>
    %233 = vector.extract_strided_slice %227 {offsets = [0, 32], sizes = [8, 32], strides = [1, 1]} : vector<8x128xf32> to vector<8x32xf32>
    %cst_79 = arith.constant 5.000000e-01 : f32
    %234 = vector.broadcast %cst_79 : f32 to vector<8x32xf32>
    %235 = arith.mulf %234, %233 : vector<8x32xf32>
    %cst_80 = arith.constant 5.000000e-01 : f32
    %236 = vector.broadcast %cst_80 : f32 to vector<8x32xf32>
    %237 = arith.addf %235, %236 : vector<8x32xf32>
    %238 = vector.extract_strided_slice %227 {offsets = [0, 64], sizes = [8, 32], strides = [1, 1]} : vector<8x128xf32> to vector<8x32xf32>
    %239 = vector.extract_strided_slice %227 {offsets = [0, 96], sizes = [8, 32], strides = [1, 1]} : vector<8x128xf32> to vector<8x32xf32>
    %cst_81 = arith.constant 5.000000e-01 : f32
    %240 = vector.broadcast %cst_81 : f32 to vector<8x32xf32>
    %241 = arith.mulf %240, %239 : vector<8x32xf32>
    %cst_82 = arith.constant 5.000000e-01 : f32
    %242 = vector.broadcast %cst_82 : f32 to vector<8x32xf32>
    %243 = arith.addf %241, %242 : vector<8x32xf32>
    %244 = arith.mulf %232, %217 : vector<8x32xf32>
    %245 = arith.mulf %237, %238 : vector<8x32xf32>
    %246 = arith.addf %244, %245 : vector<8x32xf32>
    %247 = math.tanh %246 : vector<8x32xf32>
    %248 = arith.mulf %243, %247 : vector<8x32xf32>
    %249 = arith.addf %220, %248 : vector<8x32xf32>
    %250 = vector.extract_strided_slice %13 {offsets = [64, 0], sizes = [8, 128], strides = [1, 1]} : vector<128x128xf32> to vector<8x128xf32>
    %251 = arith.truncf %248 : vector<8x32xf32> to vector<8x32xbf16>
    %cst_83 = arith.constant dense<0.000000e+00> : vector<8x128xf32>
    %252 = tpu.matmul %251, %14, %cst_83 {dimension_numbers = #tpu.dot_dimension_numbers<[1], [0], [0], [1], [0, 0, 1, 1], [], []>} : vector<8x32xbf16>, vector<32x128xbf16>, vector<8x128xf32> -> vector<8x128xf32>
    %253 = arith.addf %250, %252 : vector<8x128xf32>
    %cst_84 = arith.constant 5.000000e-01 : f32
    %254 = vector.broadcast %cst_84 : f32 to vector<8x128xf32>
    %255 = arith.mulf %253, %254 : vector<8x128xf32>
    %256 = math.tanh %255 : vector<8x128xf32>
    %257 = vector.extract_strided_slice %256 {offsets = [0, 0], sizes = [8, 32], strides = [1, 1]} : vector<8x128xf32> to vector<8x32xf32>
    %cst_85 = arith.constant 5.000000e-01 : f32
    %258 = vector.broadcast %cst_85 : f32 to vector<8x32xf32>
    %259 = arith.mulf %258, %257 : vector<8x32xf32>
    %cst_86 = arith.constant 5.000000e-01 : f32
    %260 = vector.broadcast %cst_86 : f32 to vector<8x32xf32>
    %261 = arith.addf %259, %260 : vector<8x32xf32>
    %262 = vector.extract_strided_slice %256 {offsets = [0, 32], sizes = [8, 32], strides = [1, 1]} : vector<8x128xf32> to vector<8x32xf32>
    %cst_87 = arith.constant 5.000000e-01 : f32
    %263 = vector.broadcast %cst_87 : f32 to vector<8x32xf32>
    %264 = arith.mulf %263, %262 : vector<8x32xf32>
    %cst_88 = arith.constant 5.000000e-01 : f32
    %265 = vector.broadcast %cst_88 : f32 to vector<8x32xf32>
    %266 = arith.addf %264, %265 : vector<8x32xf32>
    %267 = vector.extract_strided_slice %256 {offsets = [0, 64], sizes = [8, 32], strides = [1, 1]} : vector<8x128xf32> to vector<8x32xf32>
    %268 = vector.extract_strided_slice %256 {offsets = [0, 96], sizes = [8, 32], strides = [1, 1]} : vector<8x128xf32> to vector<8x32xf32>
    %cst_89 = arith.constant 5.000000e-01 : f32
    %269 = vector.broadcast %cst_89 : f32 to vector<8x32xf32>
    %270 = arith.mulf %269, %268 : vector<8x32xf32>
    %cst_90 = arith.constant 5.000000e-01 : f32
    %271 = vector.broadcast %cst_90 : f32 to vector<8x32xf32>
    %272 = arith.addf %270, %271 : vector<8x32xf32>
    %273 = arith.mulf %261, %246 : vector<8x32xf32>
    %274 = arith.mulf %266, %267 : vector<8x32xf32>
    %275 = arith.addf %273, %274 : vector<8x32xf32>
    %276 = math.tanh %275 : vector<8x32xf32>
    %277 = arith.mulf %272, %276 : vector<8x32xf32>
    %278 = arith.addf %249, %277 : vector<8x32xf32>
    %279 = vector.extract_strided_slice %13 {offsets = [72, 0], sizes = [8, 128], strides = [1, 1]} : vector<128x128xf32> to vector<8x128xf32>
    %280 = arith.truncf %277 : vector<8x32xf32> to vector<8x32xbf16>
    %cst_91 = arith.constant dense<0.000000e+00> : vector<8x128xf32>
    %281 = tpu.matmul %280, %14, %cst_91 {dimension_numbers = #tpu.dot_dimension_numbers<[1], [0], [0], [1], [0, 0, 1, 1], [], []>} : vector<8x32xbf16>, vector<32x128xbf16>, vector<8x128xf32> -> vector<8x128xf32>
    %282 = arith.addf %279, %281 : vector<8x128xf32>
    %cst_92 = arith.constant 5.000000e-01 : f32
    %283 = vector.broadcast %cst_92 : f32 to vector<8x128xf32>
    %284 = arith.mulf %282, %283 : vector<8x128xf32>
    %285 = math.tanh %284 : vector<8x128xf32>
    %286 = vector.extract_strided_slice %285 {offsets = [0, 0], sizes = [8, 32], strides = [1, 1]} : vector<8x128xf32> to vector<8x32xf32>
    %cst_93 = arith.constant 5.000000e-01 : f32
    %287 = vector.broadcast %cst_93 : f32 to vector<8x32xf32>
    %288 = arith.mulf %287, %286 : vector<8x32xf32>
    %cst_94 = arith.constant 5.000000e-01 : f32
    %289 = vector.broadcast %cst_94 : f32 to vector<8x32xf32>
    %290 = arith.addf %288, %289 : vector<8x32xf32>
    %291 = vector.extract_strided_slice %285 {offsets = [0, 32], sizes = [8, 32], strides = [1, 1]} : vector<8x128xf32> to vector<8x32xf32>
    %cst_95 = arith.constant 5.000000e-01 : f32
    %292 = vector.broadcast %cst_95 : f32 to vector<8x32xf32>
    %293 = arith.mulf %292, %291 : vector<8x32xf32>
    %cst_96 = arith.constant 5.000000e-01 : f32
    %294 = vector.broadcast %cst_96 : f32 to vector<8x32xf32>
    %295 = arith.addf %293, %294 : vector<8x32xf32>
    %296 = vector.extract_strided_slice %285 {offsets = [0, 64], sizes = [8, 32], strides = [1, 1]} : vector<8x128xf32> to vector<8x32xf32>
    %297 = vector.extract_strided_slice %285 {offsets = [0, 96], sizes = [8, 32], strides = [1, 1]} : vector<8x128xf32> to vector<8x32xf32>
    %cst_97 = arith.constant 5.000000e-01 : f32
    %298 = vector.broadcast %cst_97 : f32 to vector<8x32xf32>
    %299 = arith.mulf %298, %297 : vector<8x32xf32>
    %cst_98 = arith.constant 5.000000e-01 : f32
    %300 = vector.broadcast %cst_98 : f32 to vector<8x32xf32>
    %301 = arith.addf %299, %300 : vector<8x32xf32>
    %302 = arith.mulf %290, %275 : vector<8x32xf32>
    %303 = arith.mulf %295, %296 : vector<8x32xf32>
    %304 = arith.addf %302, %303 : vector<8x32xf32>
    %305 = math.tanh %304 : vector<8x32xf32>
    %306 = arith.mulf %301, %305 : vector<8x32xf32>
    %307 = arith.addf %278, %306 : vector<8x32xf32>
    %308 = vector.extract_strided_slice %13 {offsets = [80, 0], sizes = [8, 128], strides = [1, 1]} : vector<128x128xf32> to vector<8x128xf32>
    %309 = arith.truncf %306 : vector<8x32xf32> to vector<8x32xbf16>
    %cst_99 = arith.constant dense<0.000000e+00> : vector<8x128xf32>
    %310 = tpu.matmul %309, %14, %cst_99 {dimension_numbers = #tpu.dot_dimension_numbers<[1], [0], [0], [1], [0, 0, 1, 1], [], []>} : vector<8x32xbf16>, vector<32x128xbf16>, vector<8x128xf32> -> vector<8x128xf32>
    %311 = arith.addf %308, %310 : vector<8x128xf32>
    %cst_100 = arith.constant 5.000000e-01 : f32
    %312 = vector.broadcast %cst_100 : f32 to vector<8x128xf32>
    %313 = arith.mulf %311, %312 : vector<8x128xf32>
    %314 = math.tanh %313 : vector<8x128xf32>
    %315 = vector.extract_strided_slice %314 {offsets = [0, 0], sizes = [8, 32], strides = [1, 1]} : vector<8x128xf32> to vector<8x32xf32>
    %cst_101 = arith.constant 5.000000e-01 : f32
    %316 = vector.broadcast %cst_101 : f32 to vector<8x32xf32>
    %317 = arith.mulf %316, %315 : vector<8x32xf32>
    %cst_102 = arith.constant 5.000000e-01 : f32
    %318 = vector.broadcast %cst_102 : f32 to vector<8x32xf32>
    %319 = arith.addf %317, %318 : vector<8x32xf32>
    %320 = vector.extract_strided_slice %314 {offsets = [0, 32], sizes = [8, 32], strides = [1, 1]} : vector<8x128xf32> to vector<8x32xf32>
    %cst_103 = arith.constant 5.000000e-01 : f32
    %321 = vector.broadcast %cst_103 : f32 to vector<8x32xf32>
    %322 = arith.mulf %321, %320 : vector<8x32xf32>
    %cst_104 = arith.constant 5.000000e-01 : f32
    %323 = vector.broadcast %cst_104 : f32 to vector<8x32xf32>
    %324 = arith.addf %322, %323 : vector<8x32xf32>
    %325 = vector.extract_strided_slice %314 {offsets = [0, 64], sizes = [8, 32], strides = [1, 1]} : vector<8x128xf32> to vector<8x32xf32>
    %326 = vector.extract_strided_slice %314 {offsets = [0, 96], sizes = [8, 32], strides = [1, 1]} : vector<8x128xf32> to vector<8x32xf32>
    %cst_105 = arith.constant 5.000000e-01 : f32
    %327 = vector.broadcast %cst_105 : f32 to vector<8x32xf32>
    %328 = arith.mulf %327, %326 : vector<8x32xf32>
    %cst_106 = arith.constant 5.000000e-01 : f32
    %329 = vector.broadcast %cst_106 : f32 to vector<8x32xf32>
    %330 = arith.addf %328, %329 : vector<8x32xf32>
    %331 = arith.mulf %319, %304 : vector<8x32xf32>
    %332 = arith.mulf %324, %325 : vector<8x32xf32>
    %333 = arith.addf %331, %332 : vector<8x32xf32>
    %334 = math.tanh %333 : vector<8x32xf32>
    %335 = arith.mulf %330, %334 : vector<8x32xf32>
    %336 = arith.addf %307, %335 : vector<8x32xf32>
    %337 = vector.extract_strided_slice %13 {offsets = [88, 0], sizes = [8, 128], strides = [1, 1]} : vector<128x128xf32> to vector<8x128xf32>
    %338 = arith.truncf %335 : vector<8x32xf32> to vector<8x32xbf16>
    %cst_107 = arith.constant dense<0.000000e+00> : vector<8x128xf32>
    %339 = tpu.matmul %338, %14, %cst_107 {dimension_numbers = #tpu.dot_dimension_numbers<[1], [0], [0], [1], [0, 0, 1, 1], [], []>} : vector<8x32xbf16>, vector<32x128xbf16>, vector<8x128xf32> -> vector<8x128xf32>
    %340 = arith.addf %337, %339 : vector<8x128xf32>
    %cst_108 = arith.constant 5.000000e-01 : f32
    %341 = vector.broadcast %cst_108 : f32 to vector<8x128xf32>
    %342 = arith.mulf %340, %341 : vector<8x128xf32>
    %343 = math.tanh %342 : vector<8x128xf32>
    %344 = vector.extract_strided_slice %343 {offsets = [0, 0], sizes = [8, 32], strides = [1, 1]} : vector<8x128xf32> to vector<8x32xf32>
    %cst_109 = arith.constant 5.000000e-01 : f32
    %345 = vector.broadcast %cst_109 : f32 to vector<8x32xf32>
    %346 = arith.mulf %345, %344 : vector<8x32xf32>
    %cst_110 = arith.constant 5.000000e-01 : f32
    %347 = vector.broadcast %cst_110 : f32 to vector<8x32xf32>
    %348 = arith.addf %346, %347 : vector<8x32xf32>
    %349 = vector.extract_strided_slice %343 {offsets = [0, 32], sizes = [8, 32], strides = [1, 1]} : vector<8x128xf32> to vector<8x32xf32>
    %cst_111 = arith.constant 5.000000e-01 : f32
    %350 = vector.broadcast %cst_111 : f32 to vector<8x32xf32>
    %351 = arith.mulf %350, %349 : vector<8x32xf32>
    %cst_112 = arith.constant 5.000000e-01 : f32
    %352 = vector.broadcast %cst_112 : f32 to vector<8x32xf32>
    %353 = arith.addf %351, %352 : vector<8x32xf32>
    %354 = vector.extract_strided_slice %343 {offsets = [0, 64], sizes = [8, 32], strides = [1, 1]} : vector<8x128xf32> to vector<8x32xf32>
    %355 = vector.extract_strided_slice %343 {offsets = [0, 96], sizes = [8, 32], strides = [1, 1]} : vector<8x128xf32> to vector<8x32xf32>
    %cst_113 = arith.constant 5.000000e-01 : f32
    %356 = vector.broadcast %cst_113 : f32 to vector<8x32xf32>
    %357 = arith.mulf %356, %355 : vector<8x32xf32>
    %cst_114 = arith.constant 5.000000e-01 : f32
    %358 = vector.broadcast %cst_114 : f32 to vector<8x32xf32>
    %359 = arith.addf %357, %358 : vector<8x32xf32>
    %360 = arith.mulf %348, %333 : vector<8x32xf32>
    %361 = arith.mulf %353, %354 : vector<8x32xf32>
    %362 = arith.addf %360, %361 : vector<8x32xf32>
    %363 = math.tanh %362 : vector<8x32xf32>
    %364 = arith.mulf %359, %363 : vector<8x32xf32>
    %365 = arith.addf %336, %364 : vector<8x32xf32>
    %366 = vector.extract_strided_slice %13 {offsets = [96, 0], sizes = [8, 128], strides = [1, 1]} : vector<128x128xf32> to vector<8x128xf32>
    %367 = arith.truncf %364 : vector<8x32xf32> to vector<8x32xbf16>
    %cst_115 = arith.constant dense<0.000000e+00> : vector<8x128xf32>
    %368 = tpu.matmul %367, %14, %cst_115 {dimension_numbers = #tpu.dot_dimension_numbers<[1], [0], [0], [1], [0, 0, 1, 1], [], []>} : vector<8x32xbf16>, vector<32x128xbf16>, vector<8x128xf32> -> vector<8x128xf32>
    %369 = arith.addf %366, %368 : vector<8x128xf32>
    %cst_116 = arith.constant 5.000000e-01 : f32
    %370 = vector.broadcast %cst_116 : f32 to vector<8x128xf32>
    %371 = arith.mulf %369, %370 : vector<8x128xf32>
    %372 = math.tanh %371 : vector<8x128xf32>
    %373 = vector.extract_strided_slice %372 {offsets = [0, 0], sizes = [8, 32], strides = [1, 1]} : vector<8x128xf32> to vector<8x32xf32>
    %cst_117 = arith.constant 5.000000e-01 : f32
    %374 = vector.broadcast %cst_117 : f32 to vector<8x32xf32>
    %375 = arith.mulf %374, %373 : vector<8x32xf32>
    %cst_118 = arith.constant 5.000000e-01 : f32
    %376 = vector.broadcast %cst_118 : f32 to vector<8x32xf32>
    %377 = arith.addf %375, %376 : vector<8x32xf32>
    %378 = vector.extract_strided_slice %372 {offsets = [0, 32], sizes = [8, 32], strides = [1, 1]} : vector<8x128xf32> to vector<8x32xf32>
    %cst_119 = arith.constant 5.000000e-01 : f32
    %379 = vector.broadcast %cst_119 : f32 to vector<8x32xf32>
    %380 = arith.mulf %379, %378 : vector<8x32xf32>
    %cst_120 = arith.constant 5.000000e-01 : f32
    %381 = vector.broadcast %cst_120 : f32 to vector<8x32xf32>
    %382 = arith.addf %380, %381 : vector<8x32xf32>
    %383 = vector.extract_strided_slice %372 {offsets = [0, 64], sizes = [8, 32], strides = [1, 1]} : vector<8x128xf32> to vector<8x32xf32>
    %384 = vector.extract_strided_slice %372 {offsets = [0, 96], sizes = [8, 32], strides = [1, 1]} : vector<8x128xf32> to vector<8x32xf32>
    %cst_121 = arith.constant 5.000000e-01 : f32
    %385 = vector.broadcast %cst_121 : f32 to vector<8x32xf32>
    %386 = arith.mulf %385, %384 : vector<8x32xf32>
    %cst_122 = arith.constant 5.000000e-01 : f32
    %387 = vector.broadcast %cst_122 : f32 to vector<8x32xf32>
    %388 = arith.addf %386, %387 : vector<8x32xf32>
    %389 = arith.mulf %377, %362 : vector<8x32xf32>
    %390 = arith.mulf %382, %383 : vector<8x32xf32>
    %391 = arith.addf %389, %390 : vector<8x32xf32>
    %392 = math.tanh %391 : vector<8x32xf32>
    %393 = arith.mulf %388, %392 : vector<8x32xf32>
    %394 = arith.addf %365, %393 : vector<8x32xf32>
    %395 = vector.extract_strided_slice %13 {offsets = [104, 0], sizes = [8, 128], strides = [1, 1]} : vector<128x128xf32> to vector<8x128xf32>
    %396 = arith.truncf %393 : vector<8x32xf32> to vector<8x32xbf16>
    %cst_123 = arith.constant dense<0.000000e+00> : vector<8x128xf32>
    %397 = tpu.matmul %396, %14, %cst_123 {dimension_numbers = #tpu.dot_dimension_numbers<[1], [0], [0], [1], [0, 0, 1, 1], [], []>} : vector<8x32xbf16>, vector<32x128xbf16>, vector<8x128xf32> -> vector<8x128xf32>
    %398 = arith.addf %395, %397 : vector<8x128xf32>
    %cst_124 = arith.constant 5.000000e-01 : f32
    %399 = vector.broadcast %cst_124 : f32 to vector<8x128xf32>
    %400 = arith.mulf %398, %399 : vector<8x128xf32>
    %401 = math.tanh %400 : vector<8x128xf32>
    %402 = vector.extract_strided_slice %401 {offsets = [0, 0], sizes = [8, 32], strides = [1, 1]} : vector<8x128xf32> to vector<8x32xf32>
    %cst_125 = arith.constant 5.000000e-01 : f32
    %403 = vector.broadcast %cst_125 : f32 to vector<8x32xf32>
    %404 = arith.mulf %403, %402 : vector<8x32xf32>
    %cst_126 = arith.constant 5.000000e-01 : f32
    %405 = vector.broadcast %cst_126 : f32 to vector<8x32xf32>
    %406 = arith.addf %404, %405 : vector<8x32xf32>
    %407 = vector.extract_strided_slice %401 {offsets = [0, 32], sizes = [8, 32], strides = [1, 1]} : vector<8x128xf32> to vector<8x32xf32>
    %cst_127 = arith.constant 5.000000e-01 : f32
    %408 = vector.broadcast %cst_127 : f32 to vector<8x32xf32>
    %409 = arith.mulf %408, %407 : vector<8x32xf32>
    %cst_128 = arith.constant 5.000000e-01 : f32
    %410 = vector.broadcast %cst_128 : f32 to vector<8x32xf32>
    %411 = arith.addf %409, %410 : vector<8x32xf32>
    %412 = vector.extract_strided_slice %401 {offsets = [0, 64], sizes = [8, 32], strides = [1, 1]} : vector<8x128xf32> to vector<8x32xf32>
    %413 = vector.extract_strided_slice %401 {offsets = [0, 96], sizes = [8, 32], strides = [1, 1]} : vector<8x128xf32> to vector<8x32xf32>
    %cst_129 = arith.constant 5.000000e-01 : f32
    %414 = vector.broadcast %cst_129 : f32 to vector<8x32xf32>
    %415 = arith.mulf %414, %413 : vector<8x32xf32>
    %cst_130 = arith.constant 5.000000e-01 : f32
    %416 = vector.broadcast %cst_130 : f32 to vector<8x32xf32>
    %417 = arith.addf %415, %416 : vector<8x32xf32>
    %418 = arith.mulf %406, %391 : vector<8x32xf32>
    %419 = arith.mulf %411, %412 : vector<8x32xf32>
    %420 = arith.addf %418, %419 : vector<8x32xf32>
    %421 = math.tanh %420 : vector<8x32xf32>
    %422 = arith.mulf %417, %421 : vector<8x32xf32>
    %423 = arith.addf %394, %422 : vector<8x32xf32>
    %424 = vector.extract_strided_slice %13 {offsets = [112, 0], sizes = [8, 128], strides = [1, 1]} : vector<128x128xf32> to vector<8x128xf32>
    %425 = arith.truncf %422 : vector<8x32xf32> to vector<8x32xbf16>
    %cst_131 = arith.constant dense<0.000000e+00> : vector<8x128xf32>
    %426 = tpu.matmul %425, %14, %cst_131 {dimension_numbers = #tpu.dot_dimension_numbers<[1], [0], [0], [1], [0, 0, 1, 1], [], []>} : vector<8x32xbf16>, vector<32x128xbf16>, vector<8x128xf32> -> vector<8x128xf32>
    %427 = arith.addf %424, %426 : vector<8x128xf32>
    %cst_132 = arith.constant 5.000000e-01 : f32
    %428 = vector.broadcast %cst_132 : f32 to vector<8x128xf32>
    %429 = arith.mulf %427, %428 : vector<8x128xf32>
    %430 = math.tanh %429 : vector<8x128xf32>
    %431 = vector.extract_strided_slice %430 {offsets = [0, 0], sizes = [8, 32], strides = [1, 1]} : vector<8x128xf32> to vector<8x32xf32>
    %cst_133 = arith.constant 5.000000e-01 : f32
    %432 = vector.broadcast %cst_133 : f32 to vector<8x32xf32>
    %433 = arith.mulf %432, %431 : vector<8x32xf32>
    %cst_134 = arith.constant 5.000000e-01 : f32
    %434 = vector.broadcast %cst_134 : f32 to vector<8x32xf32>
    %435 = arith.addf %433, %434 : vector<8x32xf32>
    %436 = vector.extract_strided_slice %430 {offsets = [0, 32], sizes = [8, 32], strides = [1, 1]} : vector<8x128xf32> to vector<8x32xf32>
    %cst_135 = arith.constant 5.000000e-01 : f32
    %437 = vector.broadcast %cst_135 : f32 to vector<8x32xf32>
    %438 = arith.mulf %437, %436 : vector<8x32xf32>
    %cst_136 = arith.constant 5.000000e-01 : f32
    %439 = vector.broadcast %cst_136 : f32 to vector<8x32xf32>
    %440 = arith.addf %438, %439 : vector<8x32xf32>
    %441 = vector.extract_strided_slice %430 {offsets = [0, 64], sizes = [8, 32], strides = [1, 1]} : vector<8x128xf32> to vector<8x32xf32>
    %442 = vector.extract_strided_slice %430 {offsets = [0, 96], sizes = [8, 32], strides = [1, 1]} : vector<8x128xf32> to vector<8x32xf32>
    %cst_137 = arith.constant 5.000000e-01 : f32
    %443 = vector.broadcast %cst_137 : f32 to vector<8x32xf32>
    %444 = arith.mulf %443, %442 : vector<8x32xf32>
    %cst_138 = arith.constant 5.000000e-01 : f32
    %445 = vector.broadcast %cst_138 : f32 to vector<8x32xf32>
    %446 = arith.addf %444, %445 : vector<8x32xf32>
    %447 = arith.mulf %435, %420 : vector<8x32xf32>
    %448 = arith.mulf %440, %441 : vector<8x32xf32>
    %449 = arith.addf %447, %448 : vector<8x32xf32>
    %450 = math.tanh %449 : vector<8x32xf32>
    %451 = arith.mulf %446, %450 : vector<8x32xf32>
    %452 = arith.addf %423, %451 : vector<8x32xf32>
    %453 = vector.extract_strided_slice %13 {offsets = [120, 0], sizes = [8, 128], strides = [1, 1]} : vector<128x128xf32> to vector<8x128xf32>
    %454 = arith.truncf %451 : vector<8x32xf32> to vector<8x32xbf16>
    %cst_139 = arith.constant dense<0.000000e+00> : vector<8x128xf32>
    %455 = tpu.matmul %454, %14, %cst_139 {dimension_numbers = #tpu.dot_dimension_numbers<[1], [0], [0], [1], [0, 0, 1, 1], [], []>} : vector<8x32xbf16>, vector<32x128xbf16>, vector<8x128xf32> -> vector<8x128xf32>
    %456 = arith.addf %453, %455 : vector<8x128xf32>
    %cst_140 = arith.constant 5.000000e-01 : f32
    %457 = vector.broadcast %cst_140 : f32 to vector<8x128xf32>
    %458 = arith.mulf %456, %457 : vector<8x128xf32>
    %459 = math.tanh %458 : vector<8x128xf32>
    %460 = vector.extract_strided_slice %459 {offsets = [0, 0], sizes = [8, 32], strides = [1, 1]} : vector<8x128xf32> to vector<8x32xf32>
    %cst_141 = arith.constant 5.000000e-01 : f32
    %461 = vector.broadcast %cst_141 : f32 to vector<8x32xf32>
    %462 = arith.mulf %461, %460 : vector<8x32xf32>
    %cst_142 = arith.constant 5.000000e-01 : f32
    %463 = vector.broadcast %cst_142 : f32 to vector<8x32xf32>
    %464 = arith.addf %462, %463 : vector<8x32xf32>
    %465 = vector.extract_strided_slice %459 {offsets = [0, 32], sizes = [8, 32], strides = [1, 1]} : vector<8x128xf32> to vector<8x32xf32>
    %cst_143 = arith.constant 5.000000e-01 : f32
    %466 = vector.broadcast %cst_143 : f32 to vector<8x32xf32>
    %467 = arith.mulf %466, %465 : vector<8x32xf32>
    %cst_144 = arith.constant 5.000000e-01 : f32
    %468 = vector.broadcast %cst_144 : f32 to vector<8x32xf32>
    %469 = arith.addf %467, %468 : vector<8x32xf32>
    %470 = vector.extract_strided_slice %459 {offsets = [0, 64], sizes = [8, 32], strides = [1, 1]} : vector<8x128xf32> to vector<8x32xf32>
    %471 = vector.extract_strided_slice %459 {offsets = [0, 96], sizes = [8, 32], strides = [1, 1]} : vector<8x128xf32> to vector<8x32xf32>
    %cst_145 = arith.constant 5.000000e-01 : f32
    %472 = vector.broadcast %cst_145 : f32 to vector<8x32xf32>
    %473 = arith.mulf %472, %471 : vector<8x32xf32>
    %cst_146 = arith.constant 5.000000e-01 : f32
    %474 = vector.broadcast %cst_146 : f32 to vector<8x32xf32>
    %475 = arith.addf %473, %474 : vector<8x32xf32>
    %476 = arith.mulf %464, %449 : vector<8x32xf32>
    %477 = arith.mulf %469, %470 : vector<8x32xf32>
    %478 = arith.addf %476, %477 : vector<8x32xf32>
    %479 = math.tanh %478 : vector<8x32xf32>
    %480 = arith.mulf %475, %479 : vector<8x32xf32>
    %481 = arith.addf %452, %480 : vector<8x32xf32>
    %cst_147 = arith.constant 6.250000e-02 : f32
    %482 = vector.broadcast %cst_147 : f32 to vector<8x32xf32>
    %483 = arith.mulf %481, %482 : vector<8x32xf32>
    %484 = vector.extract_strided_slice %6 {offsets = [0, 0], sizes = [8, 16], strides = [1, 1]} : vector<16x16xf32> to vector<8x16xf32>
    %485 = vector.extract_strided_slice %6 {offsets = [8, 0], sizes = [8, 16], strides = [1, 1]} : vector<16x16xf32> to vector<8x16xf32>
    %c0_148 = arith.constant 0 : index
    %c0_149 = arith.constant 0 : index
    %486 = vector.load %arg8[%c0_148, %c0_149] : memref<1x32xf32, #tpu.memory_space<vmem>>, vector<1x32xf32>
    %487 = vector.broadcast %486 : vector<1x32xf32> to vector<8x32xf32>
    %488 = arith.mulf %483, %487 : vector<8x32xf32>
    %c0_150 = arith.constant 0 : index
    %c0_151 = arith.constant 0 : index
    %489 = vector.load %arg9[%c0_150, %c0_151] : memref<1x32xf32, #tpu.memory_space<vmem>>, vector<1x32xf32>
    %490 = vector.broadcast %489 : vector<1x32xf32> to vector<8x32xf32>
    %491 = arith.addf %488, %490 : vector<8x32xf32>
    %c0_152 = arith.constant 0 : index
    %c0_153 = arith.constant 0 : index
    %492 = vector.load %arg10[%c0_152, %c0_153] : memref<1x16xf32, #tpu.memory_space<vmem>>, vector<1x16xf32>
    %493 = vector.broadcast %492 : vector<1x16xf32> to vector<8x16xf32>
    %494 = arith.mulf %484, %493 : vector<8x16xf32>
    %c0_154 = arith.constant 0 : index
    %c0_155 = arith.constant 0 : index
    %495 = vector.load %arg11[%c0_154, %c0_155] : memref<1x16xf32, #tpu.memory_space<vmem>>, vector<1x16xf32>
    %496 = vector.broadcast %495 : vector<1x16xf32> to vector<8x16xf32>
    %497 = arith.addf %494, %496 : vector<8x16xf32>
    %c0_156 = arith.constant 0 : index
    %c0_157 = arith.constant 0 : index
    %498 = vector.load %arg12[%c0_156, %c0_157] : memref<1x16xf32, #tpu.memory_space<vmem>>, vector<1x16xf32>
    %499 = vector.broadcast %498 : vector<1x16xf32> to vector<8x16xf32>
    %500 = arith.mulf %485, %499 : vector<8x16xf32>
    %c0_158 = arith.constant 0 : index
    %c0_159 = arith.constant 0 : index
    %501 = vector.load %arg13[%c0_158, %c0_159] : memref<1x16xf32, #tpu.memory_space<vmem>>, vector<1x16xf32>
    %502 = vector.broadcast %501 : vector<1x16xf32> to vector<8x16xf32>
    %503 = arith.addf %500, %502 : vector<8x16xf32>
    %cst_160 = arith.constant 0.000000e+00 : f32
    %504 = vector.broadcast %cst_160 : f32 to vector<8x64xf32>
    %505 = tpu.concatenate %491, %497, %503, %504 in 1 : vector<8x32xf32>, vector<8x16xf32>, vector<8x16xf32>, vector<8x64xf32> -> vector<8x128xf32>
    %c0_161 = arith.constant 0 : index
    %c0_162 = arith.constant 0 : index
    %506 = vector.load %arg19[%c0_161, %c0_162] : memref<8x128xf32, #tpu.memory_space<vmem>>, vector<8x128xf32>
    tpu.vector_store %arg19[%c0_161, %c0_162], %505 {strides = array<i32>} : memref<8x128xf32, #tpu.memory_space<vmem>>, vector<8x128xf32>,
    %c0_163 = arith.constant 0 : index
    %c0_164 = arith.constant 0 : index
    %507 = vector.load %arg14[%c0_163, %c0_164] : memref<32x128xf32, #tpu.memory_space<vmem>>, vector<32x128xf32>
    %cst_165 = arith.constant dense<0.000000e+00> : vector<8x128xf32>
    %508 = tpu.matmul %491, %507, %cst_165 {dimension_numbers = #tpu.dot_dimension_numbers<[1], [0], [0], [1], [0, 0, 1, 1], [], []>} : vector<8x32xf32>, vector<32x128xf32>, vector<8x128xf32> -> vector<8x128xf32>
    %c0_166 = arith.constant 0 : index
    %c0_167 = arith.constant 0 : index
    %509 = vector.load %arg15[%c0_166, %c0_167] : memref<16x128xf32, #tpu.memory_space<vmem>>, vector<16x128xf32>
    %cst_168 = arith.constant dense<0.000000e+00> : vector<8x128xf32>
    %510 = tpu.matmul %497, %509, %cst_168 {dimension_numbers = #tpu.dot_dimension_numbers<[1], [0], [0], [1], [0, 0, 1, 1], [], []>} : vector<8x16xf32>, vector<16x128xf32>, vector<8x128xf32> -> vector<8x128xf32>
    %511 = arith.addf %508, %510 : vector<8x128xf32>
    %c0_169 = arith.constant 0 : index
    %c0_170 = arith.constant 0 : index
    %512 = vector.load %arg16[%c0_169, %c0_170] : memref<16x128xf32, #tpu.memory_space<vmem>>, vector<16x128xf32>
    %cst_171 = arith.constant dense<0.000000e+00> : vector<8x128xf32>
    %513 = tpu.matmul %503, %512, %cst_171 {dimension_numbers = #tpu.dot_dimension_numbers<[1], [0], [0], [1], [0, 0, 1, 1], [], []>} : vector<8x16xf32>, vector<16x128xf32>, vector<8x128xf32> -> vector<8x128xf32>
    %514 = arith.addf %511, %513 : vector<8x128xf32>
    %c0_172 = arith.constant 0 : index
    %c0_173 = arith.constant 0 : index
    %515 = vector.load %arg17[%c0_172, %c0_173] : memref<1x128xf32, #tpu.memory_space<vmem>>, vector<1x128xf32>
    %516 = vector.broadcast %515 : vector<1x128xf32> to vector<8x128xf32>
    %517 = arith.addf %514, %516 : vector<8x128xf32>
    %c0_174 = arith.constant 0 : index
    %c0_175 = arith.constant 0 : index
    %518 = vector.load %arg18[%c0_174, %c0_175] : memref<8x128xf32, #tpu.memory_space<vmem>>, vector<8x128xf32>
    tpu.vector_store %arg18[%c0_174, %c0_175], %517 {strides = array<i32>} : memref<8x128xf32, #tpu.memory_space<vmem>>, vector<8x128xf32>,
    return
  }
  func.func @transform_0(%arg0: i32) -> (i32, i32, i32) {
    %c0_i32 = arith.constant 0 : i32
    %c0_i32_0 = arith.constant 0 : i32
    %c0_i32_1 = arith.constant 0 : i32
    return %arg0, %c0_i32, %c0_i32_0 : i32, i32, i32
  }
  func.func @transform_1(%arg0: i32) -> (i32, i32, i32) {
    %c0_i32 = arith.constant 0 : i32
    %c0_i32_0 = arith.constant 0 : i32
    %c0_i32_1 = arith.constant 0 : i32
    return %arg0, %c0_i32, %c0_i32_0 : i32, i32, i32
  }
  func.func @transform_2(%arg0: i32) -> (i32, i32) {
    %c0_i32 = arith.constant 0 : i32
    %c0_i32_0 = arith.constant 0 : i32
    %c0_i32_1 = arith.constant 0 : i32
    return %c0_i32, %c0_i32_0 : i32, i32
  }
  func.func @transform_3(%arg0: i32) -> (i32, i32) {
    %c0_i32 = arith.constant 0 : i32
    %c0_i32_0 = arith.constant 0 : i32
    %c0_i32_1 = arith.constant 0 : i32
    return %c0_i32, %c0_i32_0 : i32, i32
  }
  func.func @transform_4(%arg0: i32) -> (i32, i32) {
    %c0_i32 = arith.constant 0 : i32
    %c0_i32_0 = arith.constant 0 : i32
    %c0_i32_1 = arith.constant 0 : i32
    return %c0_i32, %c0_i32_0 : i32, i32
  }
  func.func @transform_5(%arg0: i32) -> (i32, i32) {
    %c0_i32 = arith.constant 0 : i32
    %c0_i32_0 = arith.constant 0 : i32
    %c0_i32_1 = arith.constant 0 : i32
    return %c0_i32, %c0_i32_0 : i32, i32
  }
  func.func @transform_6(%arg0: i32) -> (i32, i32) {
    %c0_i32 = arith.constant 0 : i32
    %c0_i32_0 = arith.constant 0 : i32
    %c0_i32_1 = arith.constant 0 : i32
    return %c0_i32, %c0_i32_0 : i32, i32
  }
  func.func @transform_7(%arg0: i32) -> (i32, i32) {
    %c0_i32 = arith.constant 0 : i32
    %c0_i32_0 = arith.constant 0 : i32
    %c0_i32_1 = arith.constant 0 : i32
    return %c0_i32, %c0_i32_0 : i32, i32
  }
  func.func @transform_8(%arg0: i32) -> (i32, i32) {
    %c0_i32 = arith.constant 0 : i32
    %c0_i32_0 = arith.constant 0 : i32
    %c0_i32_1 = arith.constant 0 : i32
    return %c0_i32, %c0_i32_0 : i32, i32
  }
  func.func @transform_9(%arg0: i32) -> (i32, i32) {
    %c0_i32 = arith.constant 0 : i32
    %c0_i32_0 = arith.constant 0 : i32
    %c0_i32_1 = arith.constant 0 : i32
    return %c0_i32, %c0_i32_0 : i32, i32
  }
  func.func @transform_10(%arg0: i32) -> (i32, i32) {
    %c0_i32 = arith.constant 0 : i32
    %c0_i32_0 = arith.constant 0 : i32
    %c0_i32_1 = arith.constant 0 : i32
    return %c0_i32, %c0_i32_0 : i32, i32
  }
  func.func @transform_11(%arg0: i32) -> (i32, i32) {
    %c0_i32 = arith.constant 0 : i32
    %c0_i32_0 = arith.constant 0 : i32
    %c0_i32_1 = arith.constant 0 : i32
    return %c0_i32, %c0_i32_0 : i32, i32
  }
  func.func @transform_12(%arg0: i32) -> (i32, i32) {
    %c0_i32 = arith.constant 0 : i32
    %c0_i32_0 = arith.constant 0 : i32
    %c0_i32_1 = arith.constant 0 : i32
    return %c0_i32, %c0_i32_0 : i32, i32
  }
  func.func @transform_13(%arg0: i32) -> (i32, i32) {
    %c0_i32 = arith.constant 0 : i32
    %c0_i32_0 = arith.constant 0 : i32
    %c0_i32_1 = arith.constant 0 : i32
    return %c0_i32, %c0_i32_0 : i32, i32
  }
  func.func @transform_14(%arg0: i32) -> (i32, i32) {
    %c0_i32 = arith.constant 0 : i32
    %c0_i32_0 = arith.constant 0 : i32
    %c0_i32_1 = arith.constant 0 : i32
    return %c0_i32, %c0_i32_0 : i32, i32
  }
  func.func @transform_15(%arg0: i32) -> (i32, i32) {
    %c0_i32 = arith.constant 0 : i32
    %c0_i32_0 = arith.constant 0 : i32
    %c0_i32_1 = arith.constant 0 : i32
    return %c0_i32, %c0_i32_0 : i32, i32
  }
  func.func @transform_16(%arg0: i32) -> (i32, i32) {
    %c0_i32 = arith.constant 0 : i32
    %c0_i32_0 = arith.constant 0 : i32
    %c0_i32_1 = arith.constant 0 : i32
    return %c0_i32, %c0_i32_0 : i32, i32
  }
  func.func @transform_17(%arg0: i32) -> (i32, i32) {
    %c0_i32 = arith.constant 0 : i32
    %c0_i32_0 = arith.constant 0 : i32
    return %arg0, %c0_i32 : i32, i32
  }
  func.func @transform_18(%arg0: i32) -> (i32, i32) {
    %c0_i32 = arith.constant 0 : i32
    %c0_i32_0 = arith.constant 0 : i32
    return %arg0, %c0_i32 : i32, i32
  }
}

</mosaic_0001>

<bundles_post_ra>
// kernel: tpu_custom_call.1
= control target key start
LH: loop header
LB: loop body
LE: loop exit
PB: predicated region body
PF: predicated region fallthrough
CT: control target
= control target key end

     0   :  { %s2551_s0 = inlined_call_operand.vmem [shape: bf16[2,128,4], index: 0, kind: input, shape index: {}]   ;;  %s2552_s1 = inlined_call_operand.vmem [shape: bf16[2,16,32], index: 1, kind: input, shape index: {}]   ;;  %s2553_s2 = inlined_call_operand.vmem [shape: bf16[4,128], index: 2, kind: input, shape index: {}]   ;;  %s2554_s3 = inlined_call_operand.vmem [shape: bf16[32,128], index: 3, kind: input, shape index: {}]   ;;  %s2555_s4 = inlined_call_operand.vmem [shape: f32[1,128], index: 4, kind: input, shape index: {}]   ;;  %s2556_s5 = inlined_call_operand.vmem [shape: bf16[32,16], index: 5, kind: input, shape index: {}]   ;;  %s2557_s6 = inlined_call_operand.vmem [shape: f32[1,16], index: 6, kind: input, shape index: {}]   ;;  %s2558_s7 = inlined_call_operand.vmem [shape: f32[1,32], index: 7, kind: input, shape index: {}]   ;;  %s2559_s8 = inlined_call_operand.vmem [shape: f32[1,32], index: 8, kind: input, shape index: {}]   ;;  %s2560_s9 = inlined_call_operand.vmem [shape: f32[1,16], index: 9, kind: input, shape index: {}]   ;;  %s2561_s10 = inlined_call_operand.vmem [shape: f32[1,16], index: 10, kind: input, shape index: {}]   ;;  %s2562_s11 = inlined_call_operand.vmem [shape: f32[1,16], index: 11, kind: input, shape index: {}]   ;;  %s2563_s12 = inlined_call_operand.vmem [shape: f32[1,16], index: 12, kind: input, shape index: {}]   ;;  %s2564_s13 = inlined_call_operand.vmem [shape: f32[32,128], index: 13, kind: input, shape index: {}]   ;;  %s2565_s14 = inlined_call_operand.vmem [shape: f32[16,128], index: 14, kind: input, shape index: {}]   ;;  %s2566_s15 = inlined_call_operand.vmem [shape: f32[16,128], index: 15, kind: input, shape index: {}]   ;;  %s2567_s16 = inlined_call_operand.vmem [shape: f32[1,128], index: 16, kind: input, shape index: {}]   ;;  %s2568_s17 = inlined_call_operand.hbm [shape: f32[16,128], index: 17, kind: output, shape index: {0}]   ;;  %s2569_s18 = inlined_call_operand.hbm [shape: f32[16,128], index: 18, kind: output, shape index: {1}]  }
   0x1   :  { %2577 = sst [smem:[#allocation12_spill]] %s2551_s0 }
   0x2   :  { %2578 = sst [smem:[#allocation13_spill]] %s2552_s1 }
   0x3   :  { %2579 = sst [smem:[#allocation14_spill]] %s2553_s2 }
   0x4   :  { %2580 = sst [smem:[#allocation15_spill]] %s2554_s3 }
   0x5   :  { %2581 = sst [smem:[#allocation16_spill]] %s2555_s4 }
   0x6   :  { %2582 = sst [smem:[#allocation17_spill]] %s2556_s5 }
   0x7   :  { %2583 = sst [smem:[#allocation18_spill]] %s2557_s6 }
   0x8   :  { %2584 = sst [smem:[#allocation19_spill]] %s2558_s7 }
   0x9   :  { %24 = vsyncpa [#allocation3], 0 }
   0xa   :  { %26 = vsyncpa [#allocation3 + $0x1], 0 }
   0xb   :  { %27 = vsyncpa [#allocation5], 0 }
   0xc   :  { %29 = vsyncpa [#allocation5 + $0x1], 0  ;;  %s2191_s27 = smov 0   ;;  %s2193_s28 = smov 0  }
   0xd   :  { %s2195_s29 = smov 0   ;;  %s2197_s30 = smov 0  }
   0xe LB: > { %2585 = sst [smem:[#allocation8_spill]] %s2086_s29  ;;  %s2212_s0 = sadd.s32 4294967295, %s2090_s30   ;;  %s2090_s30 = sphi %s2197_s30, %s2602_s30   ;;  %s2086_s29 = sphi %s2195_s29, %s2604_s29   ;;  %s2082_s28 = sphi %s2193_s28, %s2606_s28   ;;  %s2078_s27 = sphi %s2191_s27, %s2605_s27  }
   0xf   : > { %s1764_s19 = sadd.s32 4294967294, %s2090_s30   ;;  %s2216_s1 = sadd.s32 1, %s2090_s30  }
  0x10   : > { %2586 = sst [smem:[#allocation9_spill]] %s2216_s1  ;;  %s409_s20 = sadd.s32 1, %s2086_s29 }
  0x11   : > { %s406_s21 = ssub.s32 %s2090_s30, %s2216_s1  ;;  %p419_p0 = scmp.ne.s32.totalorder %s2086_s29, %s2082_s28 }
  0x12   : > { %p407_p1 = scmp.eq.s32.totalorder %s406_s21, 0  ;;  %p420_p2 = scmp.eq.s32.totalorder %s2212_s0, 1 }
  0x13   : > { %p425_p3 = scmp.ne.s32.totalorder %s2082_s28, %s2078_s27  ;;  %p426_p4 = scmp.eq.s32.totalorder %s1764_s19, 1 }
  0x14   : > { %s2227_s22 = scalar_select %p407_p1, %s2086_s29, %s409_s20  }
  0x15   : > { %p2229_p5 = por %p420_p2, %p419_p0  ;;  %p2233_p6 = por %p426_p4, %p425_p3 }
  0x16   : > { %2587 = sst [smem:[#allocation10_spill]] %s2227_s22  ;;  %p1767_p7 = scmp.ge.s32.totalorder %s2090_s30, 1 }
  0x17   : > { %s2589_s23 = scalar_select %p2233_p6, 1, 0 }
  0x18   : > { %p531_p8 = scmp.lt.s32.totalorder %s2090_s30, 3 }
  0x19   : > { %2590 = sst [smem:[#allocation11_spill]] %s2589_s23 }
  0x1a   : > { %p532_p9 = pnand %p1767_p7, %p531_p8 }
  0x1b   : > { %s2591_s26 = sld [smem:[#allocation14_spill]] (!%p532_p9)  ;;  %p595_p10 = scmp.lt.s32.totalorder (!%p532_p9), %s2212_s0, 1 }
  0x1c   : > { %535 = sbr.rel (%p532_p9) target bundleno = 9531 (0x253b), region = 88  ;;  %s2592_s3 = sld [smem:[#allocation15_spill]] (!%p532_p9) }
  0x1d   : > { %s2593_s19 = sld [smem:[#allocation12_spill]] (!%p532_p9)  ;;  %s2571_s25 = smov (!%p532_p9), 32  }
  0x1e   : > { %s2594_s4 = sld [smem:[#allocation16_spill]] (!%p532_p9) }
  0x1f   : > { %s2595_s5 = sld [smem:[#allocation17_spill]] (!%p532_p9) }
  0x20   : > { %s2596_s1 = sld [smem:[#allocation13_spill]] (!%p532_p9) }
  0x21   : > { %v667_v0 = vld [vmem:[%s2591_s26] sm:$0x3]  ;;  %vm737_vm0 = vcmask 1041408   ;;  %s2249_s21 = scalar_select %p595_p10, %s2212_s0, 1  ;;  %vm712_vm1 = vcmask 31744   ;;  %v2092_v6 = vmov 0  }
  0x22   : > { %v2246_v1 = vld [vmem:[%s2592_s3 + $0x8] sm:$0xff]  ;;  %v739_v2 = vsel %vm737_vm0, %v667_v0, 0  ;;  %v2254_v3 = vld [vmem:[%s2592_s3] sm:$0xff]  ;;  %vm633_vm2 = vcmask 261120   ;;  %s2598_s6 = sld [smem:[#allocation18_spill]]  ;;  %vm1549_vm3 = vcmask 130048  }
  0x23   : > { %1874 = vmatpush.bf16.msra.mxu2 %v739_v2  ;;  %748 = vmatpush.bf16.msra.mxu1 %v739_v2  ;;  %s1859_s24 = sshll.u32 %s2249_s21, 6  ;;  %s1860_s26 = sshll.u32 %s2249_s21, 3  ;;  %vm1538_vm4 = vcmask 392192   ;;  %vm1540_vm5 = vcmask 523264  }
  0x24   : > { %858 = vmatpush.bf16.msra.mxu3 %v2246_v1  ;;  %s2262_s20 = scalar_lea.vmem %s2593_s19, %s1859_s24  ;;  %v2283_v9 = vld [vmem:[%s2594_s4] ss:$0 sm:$0xff]  ;;  %s2093_s24 = smov 96  }
  0x25   : > { %v1871_v4 = vld [vmem:[%s2262_s20 + $0x38] sm:$0xff]  ;;  %v1864_v5 = vld [vmem:[%s2262_s20] sm:$0xff]  ;;  %v1863_v44 = vld [vmem:[%s2595_s5 + $0x8] sm:$0xff]  ;;  %s2597_s21 = smov 32   ;;  %s2599_s7 = sld [smem:[#allocation19_spill]] }
  0x26   : > { %1826 = vmatmul.msk.bf16.vlgmr.msra.gmra.mxu2 %vm712_vm1, %v1871_v4  ;;  %1819 = vmatmul.msk.bf16.vlgmr.msra.gmra.mxu1 %vm712_vm1, %v1864_v5  ;;  %v1865_v45 = vld [vmem:[%s2262_s20 + $0x8] sm:$0xff]  ;;  %v1862_v46 = vld [vmem:[%s2595_s5] sm:$0xff]  ;;  %s604_s23 = scalar_lea.vmem %s2596_s1, %s1860_s26  ;;  %s2095_s1 = smov 48  }
  0x27   : > { %815 = vmatpush.bf16.msrb.mxu2 %v2246_v1  ;;  %643 = vmatpush.bf16.msra.mxu0 %v1863_v44  ;;  %v1861_v47 = vld [vmem:[%s604_s23] sm:$0xff] }
  0x28   : > { %859 = vmatpush.bf16.msra.mxu3 %v2254_v3 }
  0x2b   : > { %816 = vmatpush.bf16.msrb.mxu2 %v2254_v3  ;;  %644 = vmatpush.bf16.msra.mxu0 %v1862_v46 }
  0x2c   : > { %987 = vmatpush.bf16.msrb.mxu3 %v2246_v1 }
  0x2e   : > { %1786 = vmatmul.msk.bf16.vlgmr.msra.gmra.mxu0 %vm633_vm2, %v1861_v47 }
  0x2f   : > { %944 = vmatpush.bf16.msra.mxu2 %v2246_v1  ;;  %901 = vmatpush.bf16.msrb.mxu0 %v2246_v1 }
  0x30   : > { %988 = vmatpush.bf16.msrb.mxu3 %v2254_v3 }
  0x33   : > { %945 = vmatpush.bf16.msra.mxu2 %v2254_v3  ;;  %902 = vmatpush.bf16.msrb.mxu0 %v2254_v3 }
  0x36   : > { %817 = vmatmul.bf16.vlgmr.msrb.gmra.mxu2 %v2092_v6  ;;  %1820 = vmatmul.msk.bf16.gmra.mxu1 %vm712_vm1, %v1865_v45 }
  0x37   : > { %1073 = vmatpush.bf16.msrb.mxu2 %v2246_v1  ;;  %1030 = vmatpush.bf16.msra.mxu0 %v2246_v1 }
  0x3b   : > { %1074 = vmatpush.bf16.msrb.mxu2 %v2254_v3  ;;  %1031 = vmatpush.bf16.msra.mxu0 %v2254_v3 }
  0xa3   : > { %v750_v10 = vpop.f32.mrf.mxu1 }
  0xa4   : > { %v751_v11 = vadd.f32 %v2283_v9, %v750_v10 }
  0xa9   : > { %v2276_v7 = vpop.f32.mrf.mxu2 }
  0xab   : > { %v752_v29 = vpop.f32.mrf.mxu1  ;;  %v2322_v52 = vpop.f32.mrf.mxu0 }
  0xac   : > { %v753_v30 = vadd.f32 %v2283_v9, %v752_v29 }
  0xb1   : > { %v2278_v8 = vpop.f32.mrf.mxu2 }
  0xb3   : > { %v2324_v53 = vpop.f32.mrf.mxu0  ;;  %v755_v54 = vpop.f32.mrf.mxu1 }
  0xb4   : > { %v756_v55 = vadd.f32 %v2283_v9, %v755_v54 }
  0xb9   : > { %v818_v12 = vpop.f32.mrf.mxu2 }
  0xba   : > { %v822_v13 = vadd.f32 %v818_v12, %v751_v11 }
  0xbc   : > { %v823_v14 = vmul.f32 0.5, %v822_v13 }
  0xbe   : > { %1932 = vtanh.f32 %v823_v14 }
  0xc1   : > { %v820_v15 = vpop.f32.mrf.mxu2 }
  0xc4   : > { %v1933_v16 = vpop.eup %1932 }
  0xc5   : > { %829 = vrot.lane.b32.xlu0 %v1933_v16, %s2093_s24  ;;  %v825_v17 = vmul.f32 0.5, %v1933_v16  ;;  %v757_v16 = vpop.f32.mrf.mxu1 }
  0xc7   : > { %v826_v18 = vadd.f32 0.5, %v825_v17  ;;  %v758_v17 = vadd.f32 %v2283_v9, %v757_v16 }
  0xc9   : > { %v827_v21 = vmul.f32 0.0, %v826_v18 }
 0x137   : > { %v830_v19 = vpop.permute.xlu0 %829 }
 0x138   : > { %v832_v20 = vmul.f32 %v830_v19, %v826_v18 }
 0x13a   : > { %834 = vrot.lane.b32.xlu0 %v832_v20, %s2093_s24 }
 0x1ac   : > { %v835_v22 = vpop.permute.xlu0 %834 }
 0x1ad   : > { %v837_v23 = vadd.f32 %v835_v22, %v827_v21 }
 0x1af   : > { %1934 = vtanh.f32 %v837_v23 }
 0x1b5   : > { %v1935_v24 = vpop.eup %1934 }
 0x1b6   : > { %840 = vrot.lane.b32.xlu1 %v1935_v24, %s2093_s24 }
 0x228   : > { %v841_v25 = vpop.permute.xlu1 %840 }
 0x229   : > { %v2289_v26 = vmul.f32 %v841_v25, %v826_v18 }
 0x22b   : > { %v845_v27 = vpack.c.bf16 %v2289_v26, %v2289_v26 }
 0x22d   : > { %847 = vrot.lane.b32.xlu1 %v845_v27, %s2571_s25 }
 0x29f   : > { %v848_v28 = vpop.permute.xlu1 %847 }
 0x2a0   : > { %1835 = vmatmul.msk.bf16.vlgmr.msra.gmra.mxu3 %vm633_vm2, %v848_v28 }
 0x2a1   : > { %1116 = vmatpush.bf16.msra.mxu3 %v2246_v1 }
 0x2a5   : > { %1117 = vmatpush.bf16.msra.mxu3 %v2254_v3 }
 0x323   : > { %v861_v31 = vpop.f32.mrf.mxu3 }
 0x324   : > { %v865_v32 = vadd.f32 %v861_v31, %v753_v30  ;;  %v1866_v31 = vld [vmem:[%s2262_s20 + $0x10] sm:$0xff] }
 0x325   : > { %1821 = vmatmul.msk.bf16.gmra.mxu1 %vm712_vm1, %v1866_v31 }
 0x326   : > { %v866_v33 = vmul.f32 0.5, %v865_v32 }
 0x328   : > { %1936 = vtanh.f32 %v866_v33 }
 0x32b   : > { %v863_v34 = vpop.f32.mrf.mxu3 }
 0x32e   : > { %v1937_v35 = vpop.eup %1936 }
 0x32f   : > { %872 = vrot.lane.b32.xlu2 %v1937_v35, %s2093_s24  ;;  %v868_v36 = vmul.f32 0.5, %v1937_v35 }
 0x331   : > { %v869_v37 = vadd.f32 0.5, %v868_v36 }
 0x333   : > { %v870_v40 = vmul.f32 %v869_v37, %v837_v23 }
 0x389   : > { %v873_v38 = vpop.permute.xlu2 %872 }
 0x38a   : > { %v875_v39 = vmul.f32 %v873_v38, %v869_v37 }
 0x38c   : > { %877 = vrot.lane.b32.xlu2 %v875_v39, %s2093_s24 }
 0x3e6   : > { %v878_v41 = vpop.permute.xlu2 %877 }
 0x3e7   : > { %v880_v42 = vadd.f32 %v878_v41, %v870_v40 }
 0x3e9   : > { %1938 = vtanh.f32 %v880_v42 }
 0x3ef   : > { %v1939_v43 = vpop.eup %1938 }
 0x3f0   : > { %883 = vrot.lane.b32.xlu0 %v1939_v43, %s2093_s24 }
 0x462   : > { %v884_v48 = vpop.permute.xlu0 %883 }
 0x463   : > { %v886_v49 = vmul.f32 %v884_v48, %v869_v37  ;;  %v760_v37 = vpop.f32.mrf.mxu1 }
 0x464   : > { %v761_v38 = vadd.f32 %v2283_v9, %v760_v37 }
 0x465   : > { %v888_v50 = vpack.c.bf16 %v886_v49, %v886_v49  ;;  %v887_v11 = vadd.f32 %v886_v49, %v2289_v26 }
 0x467   : > { %890 = vrot.lane.b32.xlu1 %v888_v50, %s2597_s21 }
 0x4d9   : > { %v891_v51 = vpop.permute.xlu1 %890 }
 0x4da   : > { %1836 = vmatmul.msk.bf16.vlgmr.msrb.gmra.mxu0 %vm633_vm2, %v891_v51 }
 0x4db   : > { %1159 = vmatpush.bf16.msrb.mxu0 %v2246_v1 }
 0x4df   : > { %1160 = vmatpush.bf16.msrb.mxu0 %v2254_v3 }
 0x557   : > { %v904_v56 = vpop.f32.mrf.mxu0 }
 0x558   : > { %v908_v57 = vadd.f32 %v904_v56, %v756_v55 }
 0x55a   : > { %v909_v58 = vmul.f32 0.5, %v908_v57 }
 0x55c   : > { %1940 = vtanh.f32 %v909_v58 }
 0x55f   : > { %v906_v59 = vpop.f32.mrf.mxu0 }
 0x560   : > { %v762_v59 = vpop.f32.mrf.mxu1 }
 0x562   : > { %v1941_v60 = vpop.eup %1940 }
 0x563   : > { %915 = vrot.lane.b32.xlu2 %v1941_v60, %s2093_s24  ;;  %v911_v61 = vmul.f32 0.5, %v1941_v60  ;;  %v763_v60 = vadd.f32 %v2283_v9, %v762_v59 }
 0x565   : > { %v912_v62 = vadd.f32 0.5, %v911_v61 }
 0x567   : > { %v913_v2 = vmul.f32 %v912_v62, %v880_v42 }
 0x5bd   : > { %v916_v63 = vpop.permute.xlu2 %915 }
 0x5be   : > { %v918_v0 = vmul.f32 %v916_v63, %v912_v62 }
 0x5c0   : > { %920 = vrot.lane.b32.xlu0 %v918_v0, %s2093_s24 }
 0x632   : > { %v921_v4 = vpop.permute.xlu0 %920 }
 0x633   : > { %v923_v5 = vadd.f32 %v921_v4, %v913_v2 }
 0x635   : > { %1942 = vtanh.f32 %v923_v5 }
 0x63b   : > { %v1943_v6 = vpop.eup %1942 }
 0x63c   : > { %926 = vrot.lane.b32.xlu1 %v1943_v6, %s2093_s24 }
 0x6ae   : > { %v927_v10 = vpop.permute.xlu1 %926 }
 0x6af   : > { %v929_v12 = vmul.f32 %v927_v10, %v912_v62 }
 0x6b1   : > { %v930_v13 = vadd.f32 %v929_v12, %v887_v11  ;;  %v931_v14 = vpack.c.bf16 %v929_v12, %v929_v12 }
 0x6b3   : > { %933 = vrot.lane.b32.xlu2 %v931_v14, %s2597_s21 }
 0x70d   : > { %v934_v15 = vpop.permute.xlu2 %933 }
 0x70e   : > { %1837 = vmatmul.msk.bf16.vlgmr.msra.gmra.mxu2 %vm633_vm2, %v934_v15  ;;  %v1867_v15 = vld [vmem:[%s2262_s20 + $0x18] sm:$0xff] }
 0x70f   : > { %1202 = vmatpush.bf16.msra.mxu2 %v2246_v1  ;;  %1822 = vmatmul.msk.bf16.gmra.mxu1 %vm712_vm1, %v1867_v15 }
 0x713   : > { %1203 = vmatpush.bf16.msra.mxu2 %v2254_v3 }
 0x791   : > { %v947_v18 = vpop.f32.mrf.mxu2 }
 0x792   : > { %v951_v19 = vadd.f32 %v947_v18, %v758_v17 }
 0x794   : > { %v952_v20 = vmul.f32 0.5, %v951_v19 }
 0x796   : > { %1944 = vtanh.f32 %v952_v20 }
 0x799   : > { %v949_v21 = vpop.f32.mrf.mxu2 }
 0x79a   : > { %v765_v21 = vpop.f32.mrf.mxu1 }
 0x79c   : > { %v1945_v22 = vpop.eup %1944 }
 0x79d   : > { %958 = vrot.lane.b32.xlu0 %v1945_v22, %s2093_s24  ;;  %v954_v23 = vmul.f32 0.5, %v1945_v22  ;;  %v766_v22 = vadd.f32 %v2283_v9, %v765_v21 }
 0x79f   : > { %v955_v24 = vadd.f32 0.5, %v954_v23 }
 0x7a1   : > { %v956_v27 = vmul.f32 %v955_v24, %v923_v5 }
 0x80f   : > { %v959_v25 = vpop.permute.xlu0 %958 }
 0x810   : > { %v961_v26 = vmul.f32 %v959_v25, %v955_v24 }
 0x812   : > { %963 = vrot.lane.b32.xlu1 %v961_v26, %s2093_s24 }
 0x884   : > { %v964_v28 = vpop.permute.xlu1 %963 }
 0x885   : > { %v966_v29 = vadd.f32 %v964_v28, %v956_v27 }
 0x887   : > { %1946 = vtanh.f32 %v966_v29 }
 0x88d   : > { %v1947_v30 = vpop.eup %1946 }
 0x88e   : > { %969 = vrot.lane.b32.xlu2 %v1947_v30, %s2093_s24 }
 0x8e8   : > { %v970_v32 = vpop.permute.xlu2 %969 }
 0x8e9   : > { %v972_v33 = vmul.f32 %v970_v32, %v955_v24 }
 0x8eb   : > { %v973_v34 = vadd.f32 %v972_v33, %v930_v13  ;;  %v974_v35 = vpack.c.bf16 %v972_v33, %v972_v33 }
 0x8ed   : > { %976 = vrot.lane.b32.xlu0 %v974_v35, %s2597_s21 }
 0x95f   : > { %v977_v36 = vpop.permute.xlu0 %976 }
 0x960   : > { %1838 = vmatmul.msk.bf16.vlgmr.msrb.gmra.mxu3 %vm633_vm2, %v977_v36 }
 0x961   : > { %1245 = vmatpush.bf16.msrb.mxu3 %v2246_v1 }
 0x965   : > { %1246 = vmatpush.bf16.msrb.mxu3 %v2254_v3 }
 0x9e3   : > { %v990_v39 = vpop.f32.mrf.mxu3 }
 0x9e4   : > { %v994_v40 = vadd.f32 %v990_v39, %v761_v38 }
 0x9e6   : > { %v995_v41 = vmul.f32 0.5, %v994_v40 }
 0x9e8   : > { %1948 = vtanh.f32 %v995_v41  ;;  %v767_v41 = vpop.f32.mrf.mxu1 }
 0x9eb   : > { %v992_v42 = vpop.f32.mrf.mxu3 }
 0x9ec   : > { %v768_v42 = vadd.f32 %v2283_v9, %v767_v41 }
 0x9ee   : > { %v1949_v43 = vpop.eup %1948 }
 0x9ef   : > { %1001 = vrot.lane.b32.xlu1 %v1949_v43, %s2093_s24  ;;  %v997_v44 = vmul.f32 0.5, %v1949_v43 }
 0x9f1   : > { %v998_v45 = vadd.f32 0.5, %v997_v44 }
 0x9f3   : > { %v999_v48 = vmul.f32 %v998_v45, %v966_v29 }
 0xa61   : > { %v1002_v46 = vpop.permute.xlu1 %1001 }
 0xa62   : > { %v1004_v47 = vmul.f32 %v1002_v46, %v998_v45 }
 0xa64   : > { %1006 = vrot.lane.b32.xlu2 %v1004_v47, %s2093_s24 }
 0xabe   : > { %v1007_v49 = vpop.permute.xlu2 %1006 }
 0xabf   : > { %v1009_v50 = vadd.f32 %v1007_v49, %v999_v48 }
 0xac1   : > { %1950 = vtanh.f32 %v1009_v50 }
 0xac7   : > { %v1951_v51 = vpop.eup %1950 }
 0xac8   : > { %1012 = vrot.lane.b32.xlu0 %v1951_v51, %s2093_s24 }
 0xb3a   : > { %v1013_v54 = vpop.permute.xlu0 %1012 }
 0xb3b   : > { %v1015_v55 = vmul.f32 %v1013_v54, %v998_v45 }
 0xb3d   : > { %v1016_v56 = vadd.f32 %v1015_v55, %v973_v34  ;;  %v1017_v57 = vpack.c.bf16 %v1015_v55, %v1015_v55 }
 0xb3f   : > { %1019 = vrot.lane.b32.xlu1 %v1017_v57, %s2597_s21 }
 0xbb1   : > { %v1020_v58 = vpop.permute.xlu1 %1019 }
 0xbb2   : > { %1839 = vmatmul.msk.bf16.vlgmr.msra.gmra.mxu0 %vm633_vm2, %v1020_v58  ;;  %v1868_v58 = vld [vmem:[%s2262_s20 + $0x20] sm:$0xff] }
 0xbb3   : > { %1288 = vmatpush.bf16.msra.mxu0 %v2246_v1  ;;  %1823 = vmatmul.msk.bf16.gmra.mxu1 %vm712_vm1, %v1868_v58 }
 0xbb7   : > { %1289 = vmatpush.bf16.msra.mxu0 %v2254_v3 }
 0xc2f   : > { %v1033_v61 = vpop.f32.mrf.mxu0 }
 0xc30   : > { %v1037_v62 = vadd.f32 %v1033_v61, %v763_v60 }
 0xc32   : > { %v1038_v63 = vmul.f32 0.5, %v1037_v62 }
 0xc34   : > { %1952 = vtanh.f32 %v1038_v63 }
 0xc37   : > { %v1035_v0 = vpop.f32.mrf.mxu0 }
 0xc38   : > { %v770_v0 = vpop.f32.mrf.mxu1 }
 0xc3a   : > { %v1953_v2 = vpop.eup %1952 }
 0xc3b   : > { %1044 = vrot.lane.b32.xlu2 %v1953_v2, %s2093_s24  ;;  %v1040_v4 = vmul.f32 0.5, %v1953_v2  ;;  %v771_v2 = vadd.f32 %v2283_v9, %v770_v0 }
 0xc3d   : > { %v1041_v5 = vadd.f32 0.5, %v1040_v4 }
 0xc3f   : > { %v1042_v11 = vmul.f32 %v1041_v5, %v1009_v50 }
 0xc95   : > { %v1045_v6 = vpop.permute.xlu2 %1044 }
 0xc96   : > { %v1047_v10 = vmul.f32 %v1045_v6, %v1041_v5 }
 0xc98   : > { %1049 = vrot.lane.b32.xlu0 %v1047_v10, %s2093_s24 }
 0xd0a   : > { %v1050_v12 = vpop.permute.xlu0 %1049 }
 0xd0b   : > { %v1052_v13 = vadd.f32 %v1050_v12, %v1042_v11 }
 0xd0d   : > { %1954 = vtanh.f32 %v1052_v13 }
 0xd13   : > { %v1955_v14 = vpop.eup %1954 }
 0xd14   : > { %1055 = vrot.lane.b32.xlu1 %v1955_v14, %s2093_s24 }
 0xd86   : > { %v1056_v16 = vpop.permute.xlu1 %1055 }
 0xd87   : > { %v1058_v17 = vmul.f32 %v1056_v16, %v1041_v5 }
 0xd89   : > { %v1059_v18 = vadd.f32 %v1058_v17, %v1016_v56  ;;  %v1060_v19 = vpack.c.bf16 %v1058_v17, %v1058_v17 }
 0xd8b   : > { %1062 = vrot.lane.b32.xlu2 %v1060_v19, %s2597_s21 }
 0xde5   : > { %v1063_v20 = vpop.permute.xlu2 %1062 }
 0xde6   : > { %1840 = vmatmul.msk.bf16.vlgmr.msrb.gmra.mxu2 %vm633_vm2, %v1063_v20 }
 0xde7   : > { %1331 = vmatpush.bf16.msrb.mxu2 %v2246_v1 }
 0xdeb   : > { %1332 = vmatpush.bf16.msrb.mxu2 %v2254_v3 }
 0xe69   : > { %v1076_v23 = vpop.f32.mrf.mxu2 }
 0xe6a   : > { %v1080_v24 = vadd.f32 %v1076_v23, %v766_v22 }
 0xe6c   : > { %v1081_v25 = vmul.f32 0.5, %v1080_v24 }
 0xe6e   : > { %1956 = vtanh.f32 %v1081_v25  ;;  %v772_v25 = vpop.f32.mrf.mxu1 }
 0xe71   : > { %v1078_v26 = vpop.f32.mrf.mxu2 }
 0xe72   : > { %v773_v26 = vadd.f32 %v2283_v9, %v772_v25 }
 0xe74   : > { %v1957_v27 = vpop.eup %1956 }
 0xe75   : > { %1087 = vrot.lane.b32.xlu0 %v1957_v27, %s2093_s24  ;;  %v1083_v28 = vmul.f32 0.5, %v1957_v27 }
 0xe77   : > { %v1084_v29 = vadd.f32 0.5, %v1083_v28 }
 0xe79   : > { %v1085_v32 = vmul.f32 %v1084_v29, %v1052_v13 }
 0xee7   : > { %v1088_v30 = vpop.permute.xlu0 %1087 }
 0xee8   : > { %v1090_v31 = vmul.f32 %v1088_v30, %v1084_v29 }
 0xeea   : > { %1092 = vrot.lane.b32.xlu1 %v1090_v31, %s2093_s24 }
 0xf5c   : > { %v1093_v33 = vpop.permute.xlu1 %1092 }
 0xf5d   : > { %v1095_v34 = vadd.f32 %v1093_v33, %v1085_v32 }
 0xf5f   : > { %1958 = vtanh.f32 %v1095_v34 }
 0xf65   : > { %v1959_v35 = vpop.eup %1958 }
 0xf66   : > { %1098 = vrot.lane.b32.xlu2 %v1959_v35, %s2093_s24 }
 0xfc0   : > { %v1099_v36 = vpop.permute.xlu2 %1098 }
 0xfc1   : > { %v1101_v37 = vmul.f32 %v1099_v36, %v1084_v29 }
 0xfc3   : > { %v1102_v38 = vadd.f32 %v1101_v37, %v1059_v18  ;;  %v1103_v39 = vpack.c.bf16 %v1101_v37, %v1101_v37 }
 0xfc5   : > { %1105 = vrot.lane.b32.xlu0 %v1103_v39, %s2597_s21 }
0x1037   : > { %v1106_v40 = vpop.permute.xlu0 %1105 }
0x1038   : > { %1841 = vmatmul.msk.bf16.vlgmr.msra.gmra.mxu3 %vm633_vm2, %v1106_v40 }
0x1039   : > { %1374 = vmatpush.bf16.msra.mxu3 %v2246_v1 }
0x103d   : > { %1375 = vmatpush.bf16.msra.mxu3 %v2254_v3 }
0x10bb   : > { %v1119_v43 = vpop.f32.mrf.mxu3 }
0x10bc   : > { %v1123_v44 = vadd.f32 %v1119_v43, %v768_v42 }
0x10be   : > { %v1124_v45 = vmul.f32 0.5, %v1123_v44 }
0x10c0   : > { %1960 = vtanh.f32 %v1124_v45 }
0x10c3   : > { %v1121_v46 = vpop.f32.mrf.mxu3 }
0x10c6   : > { %v1961_v47 = vpop.eup %1960 }
0x10c7   : > { %1130 = vrot.lane.b32.xlu1 %v1961_v47, %s2093_s24  ;;  %v1126_v48 = vmul.f32 0.5, %v1961_v47 }
0x10c9   : > { %v1127_v49 = vadd.f32 0.5, %v1126_v48 }
0x10cb   : > { %v1128_v54 = vmul.f32 %v1127_v49, %v1095_v34 }
0x1139   : > { %v1131_v50 = vpop.permute.xlu1 %1130 }
0x113a   : > { %v1133_v51 = vmul.f32 %v1131_v50, %v1127_v49 }
0x113c   : > { %1135 = vrot.lane.b32.xlu2 %v1133_v51, %s2093_s24 }
0x1196   : > { %v1136_v55 = vpop.permute.xlu2 %1135 }
0x1197   : > { %v1138_v56 = vadd.f32 %v1136_v55, %v1128_v54 }
0x1199   : > { %1962 = vtanh.f32 %v1138_v56 }
0x119f   : > { %v1963_v57 = vpop.eup %1962 }
0x11a0   : > { %1141 = vrot.lane.b32.xlu0 %v1963_v57, %s2093_s24 }
0x1212   : > { %v1142_v59 = vpop.permute.xlu0 %1141 }
0x1213   : > { %v1144_v60 = vmul.f32 %v1142_v59, %v1127_v49 }
0x1215   : > { %v1145_v61 = vadd.f32 %v1144_v60, %v1102_v38  ;;  %v1146_v62 = vpack.c.bf16 %v1144_v60, %v1144_v60  ;;  %v1869_v38 = vld [vmem:[%s2262_s20 + $0x28] sm:$0xff] }
0x1216   : > { %1824 = vmatmul.msk.bf16.gmra.mxu1 %vm712_vm1, %v1869_v38 }
0x1217   : > { %1148 = vrot.lane.b32.xlu1 %v1146_v62, %s2597_s21 }
0x1289   : > { %v1149_v63 = vpop.permute.xlu1 %1148 }
0x128a   : > { %1842 = vmatmul.msk.bf16.vlgmr.msrb.gmra.mxu0 %vm633_vm2, %v1149_v63 }
0x128b   : > { %1417 = vmatpush.bf16.msrb.mxu0 %v2246_v1 }
0x128f   : > { %1418 = vmatpush.bf16.msrb.mxu0 %v2254_v3 }
0x1293   : > { %v775_v44 = vpop.f32.mrf.mxu1 }
0x1294   : > { %v776_v45 = vadd.f32 %v2283_v9, %v775_v44 }
0x1307   : > { %v1162_v4 = vpop.f32.mrf.mxu0 }
0x1308   : > { %v1166_v5 = vadd.f32 %v1162_v4, %v771_v2  ;;  %v777_v4 = vpop.f32.mrf.mxu1 }
0x130a   : > { %v1167_v6 = vmul.f32 0.5, %v1166_v5  ;;  %v778_v5 = vadd.f32 %v2283_v9, %v777_v4 }
0x130c   : > { %1964 = vtanh.f32 %v1167_v6 }
0x130f   : > { %v1164_v10 = vpop.f32.mrf.mxu0 }
0x1312   : > { %v1965_v11 = vpop.eup %1964 }
0x1313   : > { %1173 = vrot.lane.b32.xlu2 %v1965_v11, %s2093_s24  ;;  %v1169_v12 = vmul.f32 0.5, %v1965_v11 }
0x1315   : > { %v1170_v13 = vadd.f32 0.5, %v1169_v12 }
0x1317   : > { %v1171_v16 = vmul.f32 %v1170_v13, %v1138_v56 }
0x136d   : > { %v1174_v14 = vpop.permute.xlu2 %1173 }
0x136e   : > { %v1176_v15 = vmul.f32 %v1174_v14, %v1170_v13 }
0x1370   : > { %1178 = vrot.lane.b32.xlu0 %v1176_v15, %s2093_s24 }
0x13e2   : > { %v1179_v17 = vpop.permute.xlu0 %1178 }
0x13e3   : > { %v1181_v18 = vadd.f32 %v1179_v17, %v1171_v16 }
0x13e5   : > { %1966 = vtanh.f32 %v1181_v18 }
0x13eb   : > { %v1967_v19 = vpop.eup %1966 }
0x13ec   : > { %1184 = vrot.lane.b32.xlu1 %v1967_v19, %s2093_s24 }
0x145e   : > { %v1185_v20 = vpop.permute.xlu1 %1184 }
0x145f   : > { %v1187_v21 = vmul.f32 %v1185_v20, %v1170_v13 }
0x1461   : > { %v1188_v22 = vadd.f32 %v1187_v21, %v1145_v61  ;;  %v1189_v23 = vpack.c.bf16 %v1187_v21, %v1187_v21 }
0x1463   : > { %1191 = vrot.lane.b32.xlu2 %v1189_v23, %s2597_s21 }
0x14bd   : > { %v1192_v24 = vpop.permute.xlu2 %1191 }
0x14be   : > { %1843 = vmatmul.msk.bf16.vlgmr.msra.gmra.mxu2 %vm633_vm2, %v1192_v24 }
0x14bf   : > { %1460 = vmatpush.bf16.msra.mxu2 %v2246_v1 }
0x14c3   : > { %1461 = vmatpush.bf16.msra.mxu2 %v2254_v3 }
0x1541   : > { %v1205_v27 = vpop.f32.mrf.mxu2 }
0x1542   : > { %v1209_v28 = vadd.f32 %v1205_v27, %v773_v26 }
0x1544   : > { %v1210_v29 = vmul.f32 0.5, %v1209_v28 }
0x1546   : > { %1968 = vtanh.f32 %v1210_v29 }
0x1549   : > { %v1207_v30 = vpop.f32.mrf.mxu2 }
0x154c   : > { %v1969_v31 = vpop.eup %1968 }
0x154d   : > { %1216 = vrot.lane.b32.xlu0 %v1969_v31, %s2093_s24  ;;  %v1212_v32 = vmul.f32 0.5, %v1969_v31 }
0x154f   : > { %v1213_v33 = vadd.f32 0.5, %v1212_v32 }
0x1551   : > { %v1214_v1 = vmul.f32 %v1213_v33, %v1181_v18 }
0x15bf   : > { %v1217_v34 = vpop.permute.xlu0 %1216 }
0x15c0   : > { %v1219_v35 = vmul.f32 %v1217_v34, %v1213_v33 }
0x15c2   : > { %1221 = vrot.lane.b32.xlu1 %v1219_v35, %s2093_s24 }
0x1634   : > { %v1222_v3 = vpop.permute.xlu1 %1221 }
0x1635   : > { %v1224_v36 = vadd.f32 %v1222_v3, %v1214_v1 }
0x1637   : > { %1970 = vtanh.f32 %v1224_v36 }
0x163d   : > { %v1971_v37 = vpop.eup %1970 }
0x163e   : > { %1227 = vrot.lane.b32.xlu2 %v1971_v37, %s2093_s24 }
0x1698   : > { %v1228_v39 = vpop.permute.xlu2 %1227 }
0x1699   : > { %v1230_v40 = vmul.f32 %v1228_v39, %v1213_v33 }
0x169b   : > { %v1231_v41 = vadd.f32 %v1230_v40, %v1188_v22  ;;  %v1232_v42 = vpack.c.bf16 %v1230_v40, %v1230_v40  ;;  %v1870_v22 = vld [vmem:[%s2262_s20 + $0x30] sm:$0xff] }
0x169c   : > { %1825 = vmatmul.msk.bf16.gmra.mxu1 %vm712_vm1, %v1870_v22 }
0x169d   : > { %1234 = vrot.lane.b32.xlu0 %v1232_v42, %s2597_s21 }
0x170f   : > { %v1235_v43 = vpop.permute.xlu0 %1234 }
0x1710   : > { %1844 = vmatmul.msk.bf16.vlgmr.msrb.gmra.mxu3 %vm633_vm2, %v1235_v43 }
0x1719   : > { %v780_v28 = vpop.f32.mrf.mxu1 }
0x171a   : > { %v781_v29 = vadd.f32 %v2283_v9, %v780_v28 }
0x1793   : > { %v1248_v46 = vpop.f32.mrf.mxu3 }
0x1794   : > { %v1252_v47 = vadd.f32 %v1248_v46, %v776_v45  ;;  %v1548_v45 = vld [vmem:[%s2565_s14 + $0x8] sm:$0xff]  ;;  %v1547_v46 = vld [vmem:[%s2565_s14] sm:$0xff] }
0x1795   : > { %1566 = vmatpush.msrb.mxu3 %v1548_v45 }
0x1796   : > { %v1253_v48 = vmul.f32 0.5, %v1252_v47 }
0x1797   : > { %1567 = vmatpush.msrb.mxu3 %v1547_v46 }
0x1798   : > { %1972 = vtanh.f32 %v1253_v48  ;;  %v1924_v48 = vld [vmem:[%s2598_s6] ss:$0 sm:$0xff] }
0x179b   : > { %v1250_v49 = vpop.f32.mrf.mxu3 }
0x179c   : > { %v647_v49 = vadd.f32 %v1924_v48, %v2322_v52 }
0x179e   : > { %v1973_v50 = vpop.eup %1972 }
0x179f   : > { %1259 = vrot.lane.b32.xlu1 %v1973_v50, %s2093_s24  ;;  %v1255_v51 = vmul.f32 0.5, %v1973_v50  ;;  %v1925_v50 = vld [vmem:[%s2560_s9] ss:$0 sm:$0xff] }
0x17a1   : > { %v1256_v54 = vadd.f32 0.5, %v1255_v51  ;;  %v1509_v51 = vmul.f32 %v1925_v50, %v647_v49 }
0x17a3   : > { %v1257_v57 = vmul.f32 %v1256_v54, %v1224_v36 }
0x1811   : > { %v1260_v55 = vpop.permute.xlu1 %1259 }
0x1812   : > { %v1262_v56 = vmul.f32 %v1260_v55, %v1256_v54 }
0x1814   : > { %1264 = vrot.lane.b32.xlu2 %v1262_v56, %s2093_s24  ;;  %v782_v56 = vpop.f32.mrf.mxu1 }
0x186e   : > { %v1265_v58 = vpop.permute.xlu2 %1264 }
0x186f   : > { %v1267_v59 = vadd.f32 %v1265_v58, %v1257_v57  ;;  %v783_v57 = vadd.f32 %v2283_v9, %v782_v56  ;;  %v1544_v56 = vld [vmem:[%s2564_s13 + $0x8] sm:$0xff] }
0x1871   : > { %1974 = vtanh.f32 %v1267_v59 }
0x1877   : > { %v1975_v60 = vpop.eup %1974 }
0x1878   : > { %1270 = vrot.lane.b32.xlu0 %v1975_v60, %s2093_s24 }
0x18ea   : > { %v1271_v61 = vpop.permute.xlu0 %1270 }
0x18eb   : > { %v1273_v62 = vmul.f32 %v1271_v61, %v1256_v54  ;;  %v1926_v54 = vld [vmem:[%s2561_s10] ss:$0 sm:$0xff] }
0x18ec   : > { %v2433_v55 = vadd.f32 %v1926_v54, %v1509_v51  ;;  %v1546_v54 = vld [vmem:[%s2564_s13 + $0x18] sm:$0xff] }
0x18ed   : > { %v1274_v63 = vadd.f32 %v1273_v62, %v1231_v41  ;;  %v1275_v0 = vpack.c.bf16 %v1273_v62, %v1273_v62 }
0x18ef   : > { %1277 = vrot.lane.b32.xlu1 %v1275_v0, %s2597_s21 }
0x1961   : > { %v1278_v2 = vpop.permute.xlu1 %1277 }
0x1962   : > { %1845 = vmatmul.msk.bf16.vlgmr.msra.gmra.mxu0 %vm633_vm2, %v1278_v2 }
0x19df   : > { %v1291_v6 = vpop.f32.mrf.mxu0 }
0x19e0   : > { %v1295_v10 = vadd.f32 %v1291_v6, %v778_v5 }
0x19e2   : > { %v1296_v11 = vmul.f32 0.5, %v1295_v10 }
0x19e4   : > { %1976 = vtanh.f32 %v1296_v11 }
0x19e7   : > { %v1293_v12 = vpop.f32.mrf.mxu0 }
0x19ea   : > { %v1977_v13 = vpop.eup %1976 }
0x19eb   : > { %1302 = vrot.lane.b32.xlu2 %v1977_v13, %s2093_s24  ;;  %v1298_v14 = vmul.f32 0.5, %v1977_v13 }
0x19ed   : > { %v1299_v15 = vadd.f32 0.5, %v1298_v14 }
0x19ef   : > { %v1300_v18 = vmul.f32 %v1299_v15, %v1267_v59 }
0x1a45   : > { %v1303_v16 = vpop.permute.xlu2 %1302 }
0x1a46   : > { %v1305_v17 = vmul.f32 %v1303_v16, %v1299_v15  ;;  %v1594_v16 = vld [vmem:[%s2566_s15] sm:$0xff] }
0x1a48   : > { %1307 = vrot.lane.b32.xlu0 %v1305_v17, %s2093_s24 }
0x1aba   : > { %v1308_v19 = vpop.permute.xlu0 %1307 }
0x1abb   : > { %v1310_v20 = vadd.f32 %v1308_v19, %v1300_v18  ;;  %v649_v18 = vadd.f32 %v1924_v48, %v2324_v53  ;;  %v1927_v19 = vld [vmem:[%s2562_s11] ss:$0 sm:$0xff] }
0x1abd   : > { %1978 = vtanh.f32 %v1310_v20 }
0x1ac3   : > { %v1979_v21 = vpop.eup %1978 }
0x1ac4   : > { %1313 = vrot.lane.b32.xlu1 %v1979_v21, %s2093_s24  ;;  %v1928_v21 = vld [vmem:[%s2563_s12] ss:$0 sm:$0xff] }
0x1b36   : > { %v1314_v23 = vpop.permute.xlu1 %1313 }
0x1b37   : > { %v1316_v24 = vmul.f32 %v1314_v23, %v1299_v15  ;;  %v1595_v15 = vld [vmem:[%s2566_s15 + $0x8] sm:$0xff]  ;;  %v786_v23 = vadd.f32 %v2283_v9, %v2276_v7 }
0x1b38   : > { %1612 = vmatpush.msra.mxu0 %v1595_v15 }
0x1b39   : > { %v1317_v25 = vadd.f32 %v1316_v24, %v1274_v63  ;;  %v1318_v26 = vpack.c.bf16 %v1316_v24, %v1316_v24 }
0x1b3a   : > { %1613 = vmatpush.msra.mxu0 %v1594_v16 }
0x1b3b   : > { %1320 = vrot.lane.b32.xlu2 %v1318_v26, %s2597_s21 }
0x1b95   : > { %v1321_v27 = vpop.permute.xlu2 %1320 }
0x1b96   : > { %1846 = vmatmul.msk.bf16.vlgmr.msrb.gmra.mxu2 %vm633_vm2, %v1321_v27 }
0x1c19   : > { %v1334_v30 = vpop.f32.mrf.mxu2 }
0x1c1a   : > { %v1338_v31 = vadd.f32 %v1334_v30, %v781_v29 }
0x1c1c   : > { %v1339_v32 = vmul.f32 0.5, %v1338_v31 }
0x1c1e   : > { %1980 = vtanh.f32 %v1339_v32 }
0x1c21   : > { %v1336_v33 = vpop.f32.mrf.mxu2 }
0x1c24   : > { %v1981_v34 = vpop.eup %1980 }
0x1c25   : > { %1345 = vrot.lane.b32.xlu0 %v1981_v34, %s2093_s24  ;;  %v1341_v35 = vmul.f32 0.5, %v1981_v34 }
0x1c27   : > { %v1342_v1 = vadd.f32 0.5, %v1341_v35 }
0x1c29   : > { %v1343_v37 = vmul.f32 %v1342_v1, %v1310_v20  ;;  %v1519_v20 = vmul.f32 %v1927_v19, %v649_v18 }
0x1c2b   : > { %v1524_v22 = vadd.f32 %v1928_v21, %v1519_v20 }
0x1c97   : > { %v1346_v3 = vpop.permute.xlu0 %1345 }
0x1c98   : > { %v1348_v36 = vmul.f32 %v1346_v3, %v1342_v1 }
0x1c9a   : > { %1350 = vrot.lane.b32.xlu1 %v1348_v36, %s2093_s24 }
0x1d0c   : > { %v1351_v38 = vpop.permute.xlu1 %1350 }
0x1d0d   : > { %v1353_v39 = vadd.f32 %v1351_v38, %v1343_v37  ;;  %v788_v38 = vadd.f32 %v2283_v9, %v2278_v8 }
0x1d0f   : > { %1982 = vtanh.f32 %v1353_v39 }
0x1d15   : > { %v1983_v40 = vpop.eup %1982 }
0x1d16   : > { %1356 = vrot.lane.b32.xlu2 %v1983_v40, %s2093_s24 }
0x1d70   : > { %v1357_v41 = vpop.permute.xlu2 %1356 }
0x1d71   : > { %v1359_v42 = vmul.f32 %v1357_v41, %v1342_v1 }
0x1d73   : > { %v1360_v43 = vadd.f32 %v1359_v42, %v1317_v25  ;;  %v1361_v44 = vpack.c.bf16 %v1359_v42, %v1359_v42 }
0x1d75   : > { %1363 = vrot.lane.b32.xlu0 %v1361_v44, %s2597_s21  ;;  %v1929_v44 = vld [vmem:[%s2599_s7] ss:$0 sm:$0xff] }
0x1de7   : > { %v1364_v47 = vpop.permute.xlu0 %1363 }
0x1de8   : > { %1847 = vmatmul.msk.bf16.vlgmr.msra.gmra.mxu3 %vm633_vm2, %v1364_v47  ;;  %v1930_v47 = vld [vmem:[%s2559_s8] ss:$0 sm:$0xff] }
0x1de9   : > { %1586 = vmatpush.msra.mxu3 %v1546_v54 }
0x1df8   : > { %1850 = vmatmul.msk.f32.vlgmr.msrb.gmra.mxu3 %vm1549_vm3, %v2433_v55 }
0x1e6b   : > { %v1377_v58 = vpop.f32.mrf.mxu3 }
0x1e6c   : > { %v1381_v52 = vadd.f32 %v1377_v58, %v783_v57  ;;  %v1543_v57 = vld [vmem:[%s2564_s13] sm:$0xff] }
0x1e6e   : > { %v1382_v59 = vmul.f32 0.5, %v1381_v52 }
0x1e70   : > { %1984 = vtanh.f32 %v1382_v59 }
0x1e73   : > { %v1379_v60 = vpop.f32.mrf.mxu3 }
0x1e76   : > { %v1985_v61 = vpop.eup %1984 }
0x1e77   : > { %1388 = vrot.lane.b32.xlu1 %v1985_v61, %s2093_s24  ;;  %v1384_v62 = vmul.f32 0.5, %v1985_v61 }
0x1e79   : > { %v1385_v63 = vadd.f32 0.5, %v1384_v62 }
0x1e7b   : > { %v1386_v4 = vmul.f32 %v1385_v63, %v1353_v39 }
0x1ee9   : > { %v1389_v0 = vpop.permute.xlu1 %1388 }
0x1eea   : > { %v1391_v2 = vmul.f32 %v1389_v0, %v1385_v63 }
0x1eec   : > { %1393 = vrot.lane.b32.xlu2 %v1391_v2, %s2093_s24 }
0x1f46   : > { %v1394_v5 = vpop.permute.xlu2 %1393 }
0x1f47   : > { %v1396_v6 = vadd.f32 %v1394_v5, %v1386_v4 }
0x1f49   : > { %1986 = vtanh.f32 %v1396_v6 }
0x1f4f   : > { %v1987_v10 = vpop.eup %1986 }
0x1f50   : > { %1399 = vrot.lane.b32.xlu0 %v1987_v10, %s2093_s24 }
0x1fc2   : > { %v1400_v11 = vpop.permute.xlu0 %1399 }
0x1fc3   : > { %v1402_v12 = vmul.f32 %v1400_v11, %v1385_v63 }
0x1fc5   : > { %v1403_v13 = vadd.f32 %v1402_v12, %v1360_v43  ;;  %v1404_v14 = vpack.c.bf16 %v1402_v12, %v1402_v12 }
0x1fc7   : > { %1406 = vrot.lane.b32.xlu1 %v1404_v14, %s2597_s21 }
0x2039   : > { %v1407_v17 = vpop.permute.xlu1 %1406 }
0x203a   : > { %1848 = vmatmul.msk.bf16.vlgmr.msrb.gmra.mxu0 %vm633_vm2, %v1407_v17 }
0x204a   : > { %1852 = vmatmul.msk.f32.vlgmr.msra.gmra.mxu0 %vm1549_vm3, %v1524_v22 }
0x20b7   : > { %v1420_v24 = vpop.f32.mrf.mxu0 }
0x20b8   : > { %v1424_v25 = vadd.f32 %v1420_v24, %v786_v23 }
0x20ba   : > { %v1425_v26 = vmul.f32 0.5, %v1424_v25 }
0x20bc   : > { %1988 = vtanh.f32 %v1425_v26 }
0x20bf   : > { %v1422_v53 = vpop.f32.mrf.mxu0 }
0x20c2   : > { %v1989_v27 = vpop.eup %1988 }
0x20c3   : > { %1431 = vrot.lane.b32.xlu2 %v1989_v27, %s2093_s24  ;;  %v1427_v28 = vmul.f32 0.5, %v1989_v27 }
0x20c5   : > { %v1428_v29 = vadd.f32 0.5, %v1427_v28 }
0x20c7   : > { %v1429_v32 = vmul.f32 %v1428_v29, %v1396_v6 }
0x211d   : > { %v1432_v30 = vpop.permute.xlu2 %1431 }
0x211e   : > { %v1434_v31 = vmul.f32 %v1432_v30, %v1428_v29 }
0x2120   : > { %1436 = vrot.lane.b32.xlu0 %v1434_v31, %s2093_s24 }
0x2192   : > { %v1437_v33 = vpop.permute.xlu0 %1436 }
0x2193   : > { %v1439_v34 = vadd.f32 %v1437_v33, %v1429_v32 }
0x2195   : > { %1990 = vtanh.f32 %v1439_v34 }
0x219b   : > { %v1991_v35 = vpop.eup %1990 }
0x219c   : > { %1442 = vrot.lane.b32.xlu1 %v1991_v35, %s2093_s24 }
0x220e   : > { %v1443_v7 = vpop.permute.xlu1 %1442 }
0x220f   : > { %v1445_v1 = vmul.f32 %v1443_v7, %v1428_v29 }
0x2211   : > { %v1446_v3 = vadd.f32 %v1445_v1, %v1403_v13  ;;  %v1447_v36 = vpack.c.bf16 %v1445_v1, %v1445_v1 }
0x2213   : > { %1449 = vrot.lane.b32.xlu2 %v1447_v36, %s2597_s21 }
0x226d   : > { %v1450_v37 = vpop.permute.xlu2 %1449 }
0x226e   : > { %1849 = vmatmul.msk.bf16.vlgmr.msra.gmra.mxu2 %vm633_vm2, %v1450_v37 }
0x22f1   : > { %v1463_v39 = vpop.f32.mrf.mxu2 }
0x22f2   : > { %v1467_v40 = vadd.f32 %v1463_v39, %v788_v38 }
0x22f4   : > { %v1468_v41 = vmul.f32 0.5, %v1467_v40 }
0x22f6   : > { %1992 = vtanh.f32 %v1468_v41 }
0x22f9   : > { %v1465_v42 = vpop.f32.mrf.mxu2 }
0x22fc   : > { %v1993_v43 = vpop.eup %1992 }
0x22fd   : > { %1474 = vrot.lane.b32.xlu0 %v1993_v43, %s2093_s24  ;;  %v1470_v45 = vmul.f32 0.5, %v1993_v43 }
0x22ff   : > { %v1471_v46 = vadd.f32 0.5, %v1470_v45 }
0x2301   : > { %v1472_v48 = vmul.f32 %v1471_v46, %v1439_v34 }
0x2305   : > { %1494 = vrot.lane.b32.xlu0 %v1929_v44, %s2093_s24 }
0x230d   : > { %1530 = vrot.lane.b32.xlu0 %v2433_v55, %s2597_s21  ;;  %v1545_v55 = vld [vmem:[%s2564_s13 + $0x10] sm:$0xff] }
0x230e   : > { %1587 = vmatpush.msra.mxu3 %v1545_v55 }
0x2310   : > { %1588 = vmatpush.msra.mxu3 %v1544_v56 }
0x2312   : > { %1589 = vmatpush.msra.mxu3 %v1543_v57 }
0x236f   : > { %v1475_v8 = vpop.permute.xlu0 %1474 }
0x2370   : > { %v1477_v9 = vmul.f32 %v1475_v8, %v1471_v46 }
0x2372   : > { %1479 = vrot.lane.b32.xlu1 %v1477_v9, %s2093_s24 }
0x2377   : > { %v1495_v61 = vpop.permute.xlu0 %1494 }
0x237a   : > { %1501 = vrot.lane.b32.xlu1 %v1930_v47, %s2093_s24 }
0x237f   : > { %v1531_v2 = vpop.permute.xlu0 %1530 }
0x2382   : > { %1534 = vrot.lane.b32.xlu1 %v1524_v22, %s2095_s1  ;;  %s1855_s1 = sshll.u32 %s2212_s0, 3  ;;  %s2016_s0 = scalar_lea.hbm %s2569_s18, 16 }
0x2383   : > { %s1655_s25 = scalar_lea.hbm %s2569_s18, %s1855_s1 }
0x2384   : > { %s1659_s19 = sshll.u32 %s1655_s25, 4  ;;  %s1660_s19 = int_to_ptr.hbm [resolvable:$true] %s1659_s19 }
0x2385   : > { %s2010_s22 = sshra.s32 %s1660_s19, 4  ;;  %s2011_s22 = int_to_ptr.hbm [resolvable:$true] %s2010_s22 }
0x2386   : > { %s2012_s3 = scalar_lea.hbm %s2011_s22, 8  ;;  %p2017_p0 = scmp.lt.s32.totalorder %s2011_s22, %s2569_s18 }
0x2387   : > { %p2013_p11 = scmp.ne.s32.totalorder %s2011_s22, %s2012_s3  ;;  %p2018_p1 = scmp.lt.s32.totalorder %s2016_s0, %s2012_s3 }
0x2389   : > { %p2014_p12 = pnand %p2013_p11, %p2229_p5  ;;  %p2019_p2 = por %p2018_p1, %p2017_p0 }
0x238b   : > { %p2015_p13 = pneg %p2014_p12 }
0x238d   : > { %p2020_p3 = pnand %p2019_p2, %p2015_p13 }
0x23e4   : > { %v1480_v49 = vpop.permute.xlu1 %1479 }
0x23e5   : > { %v1482_v50 = vadd.f32 %v1480_v49, %v1472_v48 }
0x23e7   : > { %1994 = vtanh.f32 %v1482_v50 }
0x23ec   : > { %v1502_v63 = vpop.permute.xlu1 %1501 }
0x23ed   : > { %v1995_v51 = vpop.eup %1994 }
0x23ee   : > { %1485 = vrot.lane.b32.xlu2 %v1995_v51, %s2093_s24  ;;  %s2493_s24 = sand.u32 1, %s2082_s28  }
0x23ef   : > { %s2576_s4 = sshll.u32 %s2493_s24, 3  ;;  %s1631_s29 = scalar_lea.sflag [#allocation5], %s2493_s24 }
0x23f4   : > { %v1535_v5 = vpop.permute.xlu1 %1534 }
0x2448   : > { %v1486_v58 = vpop.permute.xlu2 %1485 }
0x2449   : > { %v1488_v52 = vmul.f32 %v1486_v58, %v1471_v46 }
0x244b   : > { %v1489_v59 = vadd.f32 %v1488_v52, %v1446_v3 }
0x244d   : > { %v1490_v60 = vmul.f32 0.0625, %v1489_v59 }
0x244f   : > { %v1497_v62 = vmul.f32 %v1495_v61, %v1490_v60 }
0x2451   : > { %v1504_v0 = vadd.f32 %v1502_v63, %v1497_v62 }
0x2453   : > { %1526 = vrot.lane.b32.xlu2 %v1504_v0, %s2597_s21  ;;  %s594_s21 = scalar_lea.vmem [#allocation4], %s2576_s4 }
0x2454   : > { %s1657_s26 = sshll.u32 %s594_s21, 4  ;;  %s1658_s26 = int_to_ptr.vmem [resolvable:$true] %s1657_s26 }
0x24ad   : > { %v1527_v4 = vpop.permute.xlu2 %1526 }
0x24ae   : > { %v1537_v6 = vsel %vm633_vm2, %v1527_v4, %v1531_v2  ;;  %1851 = vmatmul.msk.f32.vlgmr.msra.gmra.mxu3 %vm633_vm2, %v1527_v4 }
0x24af   : > { %v1539_v10 = vsel %vm1538_vm4, %v1537_v6, %v1535_v5 }
0x24b0   : > { %v1541_v11 = vsel %vm1540_vm5, %v1539_v10, 0.0 }
0x24b1   : > { %1542 = vst [vmem:[%s594_s21] sm:$0xff] %v1541_v11 }
0x24b2   : > { %2023 = shalt.err (!%p2020_p3)
}
0x24b3   : > { %1876 = dma.vmem_to_hbm [thread:$0]  (%p2229_p5), %s1658_s26, 128, %s1660_s19, %s1631_s29   ;;  %v1569_v12 = vpop.f32.mrf.mxu3  ;;  %v1931_v15 = vld [vmem:[%s2567_s16] ss:$0 sm:$0xff]  ;;  %v1615_v16 = vpop.f32.mrf.mxu0 }
0x24b4   : > { %s1641_s20 = scalar_lea.hbm %s2568_s17, %s1855_s1  ;;  %s2600_s6 = sshll.u32 %s2493_s24, 3 }
0x24b5   : > { %s587_s7 = scalar_lea.vmem [#allocation2], %s2600_s6  ;;  %s1645_s22 = sshll.u32 %s1641_s20, 4  ;;  %s1646_s22 = int_to_ptr.hbm [resolvable:$true] %s1645_s22 }
0x24b6   : > { %s1643_s25 = sshll.u32 %s587_s7, 4  ;;  %s1626_s26 = scalar_lea.sflag [#allocation3], %s2493_s24  ;;  %s1644_s25 = int_to_ptr.vmem [resolvable:$true] %s1643_s25 }
0x24b7   : > { %s2038_s19 = sshra.s32 %s1646_s22, 4  ;;  %s2044_s0 = scalar_lea.hbm %s2568_s17, 16  ;;  %s2039_s19 = int_to_ptr.hbm [resolvable:$true] %s2038_s19 }
0x24b8   : > { %s2040_s1 = scalar_lea.hbm %s2039_s19, 8  ;;  %p2045_p9 = scmp.lt.s32.totalorder %s2039_s19, %s2568_s17 }
0x24b9   : > { %p2041_p4 = scmp.ne.s32.totalorder %s2039_s19, %s2040_s1  ;;  %p2046_p10 = scmp.lt.s32.totalorder %s2044_s0, %s2040_s1 }
0x24bb   : > { %p2042_p7 = pnand %p2041_p4, %p2229_p5  ;;  %p2047_p11 = por %p2046_p10, %p2045_p9 }
0x24bd   : > { %p2043_p8 = pneg %p2042_p7 }
0x24bf   : > { %p2048_p12 = pnand %p2047_p11, %p2043_p8 }
0x2531   : > { %v1591_v13 = vpop.f32.mrf.mxu3 }
0x2532   : > { %v1592_v14 = vadd.f32 %v1591_v13, %v1569_v12 }
0x2534   : > { %v1618_v17 = vadd.f32 %v1615_v16, %v1592_v14 }
0x2536   : > { %v1623_v18 = vadd.f32 %v1931_v15, %v1618_v17 }
0x2538   : > { %1624 = vst [vmem:[%s587_s7] sm:$0xff] %v1623_v18 }
0x2539   : > { %2051 = shalt.err (!%p2048_p12)
}
0x253a   : > { %1875 = dma.vmem_to_hbm [thread:$0]  (%p2229_p5), %s1644_s25, 128, %s1646_s22, %s1626_s26  }
0x253b PF: > { %p1886_p13 = scmp.ge.s32.totalorder %s2090_s30, 2  ;;  %s1671_s20 = sand.u32 1, %s2078_s27  }
0x253c   : > { %s1672_s5 = scalar_lea.sflag [#allocation3], %s1671_s20 }
0x253d   : > { %p1880_p0 = pnand %p1886_p13, %p2233_p6 }
0x253f   : > { %p1881_p1 = pneg %p1880_p0 }
0x2541   : > { %2069 = dma.done.wait (%p1881_p1), %s1672_s5, 128  }
0x2542   : > { %2071 = vsyncadd (%p1881_p1), %s1672_s5, 4294967168  ;;  %s1682_s4 = scalar_lea.sflag [#allocation5], %s1671_s20 }
0x2543   : > { %2073 = dma.done.wait (%p1881_p1), %s1682_s4, 128  }
0x2544   : > { %2075 = vsyncadd (%p1881_p1), %s1682_s4, 4294967168  ;;  %s2602_s30 = sld [smem:[#allocation9_spill]]  ;;  %s2605_s27 = smov %s2082_s28 }
0x2545   : > { %s2603_s6 = sld [smem:[#allocation8_spill]] }
0x2546   : > { %s2604_s29 = sld [smem:[#allocation10_spill]] }
0x254a   : > { %p32_p5 = scmp.ge.s32.totalorder %s2602_s30, 4  }
0x254b   : > { %s2606_s28 = smov %s2603_s6 }
0x254c   :  { %34 = sbr.rel (!%p32_p5) target bundleno = 14 (0xe), region = 143 }
0x2551   :  { %1688 = vsyncpa [#allocation3], 1 }
0x2552   :  { %1690 = vsyncpa [#allocation3 + $0x1], 1 }
0x2553   :  { %1691 = vsyncpa [#allocation5], 1 }
0x2554   :  { %1693 = vsyncpa [#allocation5 + $0x1], 1 }

</bundles_post_ra>
